<compile_context>
chip_gen: v7x
topology: tpu7x:2x2x1
jax: 0.10.0
libtpu: 0.0.40
codegen_flags: <defaults>
</compile_context>

<pallas_src>
import functools

import jax
import jax.numpy as jnp
from jax.experimental import pallas as pl
from jax.experimental.pallas import tpu as pltpu


VMEM_LIMIT_BYTES = 48 * 1024 * 1024     # <= physical VMEM on v5e/v6e (128 MiB) and v7x (64 MiB)
FUSED_MAX_NPAD = 2048                   # bf16 A_hat <= 8 MiB -> single fused kernel
RESIDENT_BYTES_BUDGET = 24 * 1024 * 1024  # cap for resident x / p (double-buffer assumed)


def _round_up(x, m):
    return ((x + m - 1) // m) * m


def _pad2(a, rows, cols, dtype):
    out = jnp.zeros((rows, cols), dtype)
    return out.at[: a.shape[0], : a.shape[1]].set(a.astype(dtype))


# ---------------------------------------------------------------------------
# Fused single-call kernel (small/medium graphs): whole padded A_hat resident
# in VMEM, both GIN layers computed in one pass -> A_hat read from HBM once.
# ---------------------------------------------------------------------------
def gin2_fused_kernel(adj_ref, x_ref,
                      w1a_ref, b1a_ref, w1b_ref, b1b_ref,
                      w2a_ref, b2a_ref, w2b_ref, b2b_ref, o_ref):
    adj = adj_ref[...]                                          # (n_pad, n_pad) bf16
    # layer-1 aggregation: A_hat @ x   (bf16 x bf16, f32 accumulation on MXU)
    agg1 = jnp.dot(adj, x_ref[...], preferred_element_type=jnp.float32)
    # MLP1: Linear -> ReLU -> Linear, then inter-layer ReLU
    # TODO(synk): training-mode dropout(p=0.1) not implemented (eval semantics).
    h = jnp.dot(agg1.astype(jnp.bfloat16), w1a_ref[...],
                preferred_element_type=jnp.float32) + b1a_ref[...]
    h = jnp.maximum(h, 0.0)
    h = jnp.dot(h.astype(jnp.bfloat16), w1b_ref[...],
                preferred_element_type=jnp.float32) + b1b_ref[...]
    h = jnp.maximum(h, 0.0)
    # hoisted layer-2 first Linear (no bias); exact because matmul distributes
    # over the neighbour sum — bias is added after the aggregation below.
    p = jnp.dot(h.astype(jnp.bfloat16), w2a_ref[...],
                preferred_element_type=jnp.float32)
    # layer-2 aggregation on the already-resident A_hat (no second HBM read)
    agg2 = jnp.dot(adj, p.astype(jnp.bfloat16),
                   preferred_element_type=jnp.float32)
    z = jnp.maximum(agg2 + b2a_ref[...], 0.0)
    out = jnp.dot(z.astype(jnp.bfloat16), w2b_ref[...],
                  preferred_element_type=jnp.float32) + b2b_ref[...]
    o_ref[...] = out.astype(o_ref.dtype)


# ---------------------------------------------------------------------------
# Tiled kernel 1: layer-1 aggregation (A_hat @ x reduced over k tiles) with a
# fused epilogue on the last reduction step: MLP1, inter-layer ReLU, and the
# hoisted layer-2 projection (w2a, no bias).
# ---------------------------------------------------------------------------
def gin_layer1_kernel(adj_ref, x_ref,
                      w1a_ref, b1a_ref, w1b_ref, b1b_ref, w2a_ref,
                      p_ref, acc_ref, *, tile_k, x_resident):
    k = pl.program_id(1)

    @pl.when(k == 0)
    def _():
        acc_ref[...] = jnp.zeros_like(acc_ref)

    if x_resident:
        # x lives fully in VMEM (constant index_map) -> slice the k rows here
        # instead of re-streaming x from HBM for every i tile.
        row0 = pl.multiple_of(k * tile_k, tile_k)
        x_blk = x_ref[pl.ds(row0, tile_k), :]
    else:
        x_blk = x_ref[...]

    acc_ref[...] += jnp.dot(adj_ref[...], x_blk,
                            preferred_element_type=jnp.float32)

    @pl.when(k == pl.num_programs(1) - 1)
    def _():
        agg = acc_ref[...]                                      # (tile_m, c_pad) f32
        h = jnp.dot(agg.astype(jnp.bfloat16), w1a_ref[...],
                    preferred_element_type=jnp.float32) + b1a_ref[...]
        h = jnp.maximum(h, 0.0)
        h = jnp.dot(h.astype(jnp.bfloat16), w1b_ref[...],
                    preferred_element_type=jnp.float32) + b1b_ref[...]
        # inter-layer ReLU; dropout(p=0.1) is identity in eval mode
        # TODO(synk): training-mode dropout not implemented (eval semantics).
        h = jnp.maximum(h, 0.0)
        # hoisted layer-2 projection; its bias is added after the aggregation
        # in kernel 2 (matmul distributes over the sum).
        p = jnp.dot(h.astype(jnp.bfloat16), w2a_ref[...],
                    preferred_element_type=jnp.float32)
        # p stays bf16 so layer-2 aggregation runs at native MXU bf16 rate;
        # rounding error validated against the f32 reference below.
        p_ref[...] = p.astype(p_ref.dtype)


# ---------------------------------------------------------------------------
# Tiled kernel 2: layer-2 aggregation (A_hat @ p) + bias, ReLU, final Linear.
# ---------------------------------------------------------------------------
def gin_layer2_kernel(adj_ref, p_ref, b2a_ref, w2b_ref, b2b_ref,
                      o_ref, acc_ref, *, tile_k, p_resident):
    k = pl.program_id(1)

    @pl.when(k == 0)
    def _():
        acc_ref[...] = jnp.zeros_like(acc_ref)

    if p_resident:
        row0 = pl.multiple_of(k * tile_k, tile_k)
        p_blk = p_ref[pl.ds(row0, tile_k), :]
    else:
        p_blk = p_ref[...]

    acc_ref[...] += jnp.dot(adj_ref[...], p_blk,
                            preferred_element_type=jnp.float32)

    @pl.when(k == pl.num_programs(1) - 1)
    def _():
        z = jnp.maximum(acc_ref[...] + b2a_ref[...], 0.0)
        out = jnp.dot(z.astype(jnp.bfloat16), w2b_ref[...],
                      preferred_element_type=jnp.float32) + b2b_ref[...]
        o_ref[...] = out.astype(o_ref.dtype)


def _select_tiling(n):
    """Adaptive node padding & tile size.

    Small graphs -> fused single-call path (tile=None). Larger graphs pick the
    biggest adjacency tile (1024/512/256) whose *squared* padding waste stays
    <= ~15%; a single tile for both grid axes keeps the grid always valid.
    With FUSED_MAX_NPAD=2048 the tiled path always has >= 3 i-tiles, so both
    v7x TensorCores get work on the 'parallel' axis.
    """
    base_pad = _round_up(n, 256)
    if base_pad <= FUSED_MAX_NPAD:
        return base_pad, None
    tile = 256
    for t in (1024, 512):
        cand = _round_up(n, t)
        if cand * cand <= 1.15 * base_pad * base_pad:
            tile = t
            break
    return _round_up(n, tile), tile


def gin2_forward(x, edge_index, params, *, eps=0.0):
    """x: [N, in_channels] f32, edge_index: [2, E] int32 (row 0 = src, row 1 = dst)."""
    n, in_c = x.shape
    hid = params["w1a"].shape[1]
    out_c = params["w2b"].shape[1]

    c_pad = _round_up(in_c, 128)
    h_pad = _round_up(hid, 128)
    o_pad = _round_up(out_c, 128)
    n_pad, tile = _select_tiling(n)

    # ---- plain-JAX glue -----------------------------------------------------
    # A_hat = A + (1+eps) I, built DIRECTLY in bf16 (entries are small exact
    # counts / 1+eps) so there is no extra f32 scatter + cast pass over the
    # N^2 array.  Diagonal only for real nodes -> padded (phantom) columns are
    # all-zero and padded rows can never leak into real outputs (their rows of
    # the output are sliced off below).
    # TODO(synk): for very large sparse graphs replace the O(N^2) dense A_hat
    # with a CSR / scalar-prefetch gather-aggregation kernel.
    # TODO(synk): int8 A_hat/feature fast path for v5e/v6e (int8 MXU) not
    # implemented; v7x has no integer MXU, so bf16 is kept for portability.
    src = edge_index[0].astype(jnp.int32)
    dst = edge_index[1].astype(jnp.int32)
    adj = jnp.zeros((n_pad, n_pad), jnp.bfloat16)
    adj = adj.at[dst, src].add(jnp.ones(src.shape, jnp.bfloat16))
    diag = jnp.arange(n, dtype=jnp.int32)
    adj = adj.at[diag, diag].add(jnp.full((n,), 1.0 + eps, jnp.bfloat16))

    x_p = _pad2(x, n_pad, c_pad, jnp.bfloat16)
    # weights in bf16 (native MXU rate, half the resident VMEM); biases f32.
    w1a = _pad2(params["w1a"], c_pad, h_pad, jnp.bfloat16)
    b1a = _pad2(params["b1a"], 1, h_pad, jnp.float32)
    w1b = _pad2(params["w1b"], h_pad, h_pad, jnp.bfloat16)
    b1b = _pad2(params["b1b"], 1, h_pad, jnp.float32)
    w2a = _pad2(params["w2a"], h_pad, o_pad, jnp.bfloat16)
    b2a = _pad2(params["b2a"], 1, o_pad, jnp.float32)
    w2b = _pad2(params["w2b"], o_pad, o_pad, jnp.bfloat16)
    b2b = _pad2(params["b2b"], 1, o_pad, jnp.float32)

    w_bytes = 2 * (c_pad * h_pad + h_pad * h_pad + h_pad * o_pad + o_pad * o_pad)
    b_bytes = 4 * (2 * h_pad + 2 * o_pad)

    # ---- fused single-call path (A_hat read from HBM exactly once) ----------
    if tile is None:
        flops = (2 * n_pad * n_pad * (c_pad + o_pad)
                 + 2 * n_pad * (c_pad * h_pad + h_pad * h_pad
                                + h_pad * o_pad + o_pad * o_pad))
        bytes_ = (n_pad * n_pad * 2 + n_pad * c_pad * 2 + w_bytes + b_bytes
                  + n_pad * o_pad * 4)
        out = pl.pallas_call(
            gin2_fused_kernel,
            out_shape=jax.ShapeDtypeStruct((n_pad, o_pad), jnp.float32),
            compiler_params=pltpu.CompilerParams(
                vmem_limit_bytes=VMEM_LIMIT_BYTES),
            cost_estimate=pl.CostEstimate(flops=flops, transcendentals=0,
                                          bytes_accessed=bytes_),
        )(adj, x_p, w1a, b1a, w1b, b1b, w2a, b2a, w2b, b2b)
        return out[:n, :out_c]

    # ---- tiled two-call path -------------------------------------------------
    grid = (n_pad // tile, n_pad // tile)
    x_resident = 2 * n_pad * c_pad * 2 <= RESIDENT_BYTES_BUDGET
    p_resident = 2 * n_pad * o_pad * 2 <= RESIDENT_BYTES_BUDGET

    cparams = pltpu.CompilerParams(
        dimension_semantics=("parallel", "arbitrary"),
        vmem_limit_bytes=VMEM_LIMIT_BYTES,
    )
    const = lambda i, k: (0, 0)  # weights/biases/resident operands stay in VMEM
    # Large (512/1024) adjacency tiles, triple-buffered: the kernel is HBM
    # bound on this stream, so the DMA pipeline must never stall.
    adj_spec = pl.BlockSpec((tile, tile), lambda i, k: (i, k),
                            pipeline_mode=pl.Buffered(3))

    # ---- layer 1 (+ hoisted layer-2 projection) ------------------------------
    x_spec = (pl.BlockSpec((n_pad, c_pad), const) if x_resident
              else pl.BlockSpec((tile, c_pad), lambda i, k: (k, 0)))
    x_reads = 1 if x_resident else grid[0]
    flops1 = (2 * n_pad * n_pad * c_pad
              + 2 * n_pad * (c_pad * h_pad + h_pad * h_pad + h_pad * o_pad))
    bytes1 = (n_pad * n_pad * 2 + x_reads * n_pad * c_pad * 2
              + 2 * (c_pad * h_pad + h_pad * h_pad + h_pad * o_pad)
              + 4 * 2 * h_pad + n_pad * o_pad * 2)
    kern1 = functools.partial(gin_layer1_kernel, tile_k=tile,
                              x_resident=x_resident)
    p = pl.pallas_call(
        kern1,
        out_shape=jax.ShapeDtypeStruct((n_pad, o_pad), jnp.bfloat16),
        grid_spec=pltpu.PrefetchScalarGridSpec(
            num_scalar_prefetch=0,
            grid=grid,
            in_specs=[
                adj_spec,                                       # A_hat
                x_spec,                                         # x (resident or streamed)
                pl.BlockSpec((c_pad, h_pad), const),            # w1a
                pl.BlockSpec((1, h_pad), const),                # b1a
                pl.BlockSpec((h_pad, h_pad), const),            # w1b
                pl.BlockSpec((1, h_pad), const),                # b1b
                pl.BlockSpec((h_pad, o_pad), const),            # w2a
            ],
            out_specs=pl.BlockSpec((tile, o_pad), lambda i, k: (i, 0)),
            scratch_shapes=[pltpu.VMEM((tile, c_pad), jnp.float32)]),
        compiler_params=cparams,
        cost_estimate=pl.CostEstimate(flops=flops1, transcendentals=0,
                                      bytes_accessed=bytes1),
    )(adj, x_p, w1a, b1a, w1b, b1b, w2a)

    # ---- layer 2 aggregation + epilogue ---------------------------------------
    p_spec = (pl.BlockSpec((n_pad, o_pad), const) if p_resident
              else pl.BlockSpec((tile, o_pad), lambda i, k: (k, 0)))
    p_reads = 1 if p_resident else grid[0]
    flops2 = 2 * n_pad * n_pad * o_pad + 2 * n_pad * o_pad * o_pad
    bytes2 = (n_pad * n_pad * 2 + p_reads * n_pad * o_pad * 2
              + 2 * o_pad * o_pad + 4 * 2 * o_pad + n_pad * o_pad * 4)
    kern2 = functools.partial(gin_layer2_kernel, tile_k=tile,
                              p_resident=p_resident)
    out = pl.pallas_call(
        kern2,
        out_shape=jax.ShapeDtypeStruct((n_pad, o_pad), jnp.float32),
        grid_spec=pltpu.PrefetchScalarGridSpec(
            num_scalar_prefetch=0,
            grid=grid,
            in_specs=[
                adj_spec,                                       # A_hat
                p_spec,                                         # p (resident or streamed)
                pl.BlockSpec((1, o_pad), const),                # b2a
                pl.BlockSpec((o_pad, o_pad), const),            # w2b
                pl.BlockSpec((1, o_pad), const),                # b2b
            ],
            out_specs=pl.BlockSpec((tile, o_pad), lambda i, k: (i, 0)),
            scratch_shapes=[pltpu.VMEM((tile, o_pad), jnp.float32)]),
        compiler_params=cparams,
        cost_estimate=pl.CostEstimate(flops=flops2, transcendentals=0,
                                      bytes_accessed=bytes2),
    )(adj, p, b2a, w2b, b2b)

    return out[:n, :out_c]


def gin2_reference(x, edge_index, params, eps=0.0):
    """Pure-JAX f32 reference (eval-mode GIN2)."""
    n = x.shape[0]
    adj = jnp.zeros((n, n), jnp.float32).at[edge_index[1], edge_index[0]].add(1.0)
    h = (1.0 + eps) * x + adj @ x
    h = jnp.maximum(h @ params["w1a"] + params["b1a"], 0.0)
    h = h @ params["w1b"] + params["b1b"]
    h = jnp.maximum(h, 0.0)
    h = (1.0 + eps) * h + adj @ h
    h = jnp.maximum(h @ params["w2a"] + params["b2a"], 0.0)
    h = h @ params["w2b"] + params["b2b"]
    return h


def init_params(key, in_channels, num_hid, out_channels):
    ks = jax.random.split(key, 4)

    def lin(k, fan_in, fan_out):
        kw, kb = jax.random.split(k)
        scale = 1.0 / jnp.sqrt(jnp.float32(fan_in))
        w = jax.random.uniform(kw, (fan_in, fan_out), jnp.float32, -scale, scale)
        b = jax.random.uniform(kb, (1, fan_out), jnp.float32, -scale, scale)
        return w, b

    w1a, b1a = lin(ks[0], in_channels, num_hid)
    w1b, b1b = lin(ks[1], num_hid, num_hid)
    w2a, b2a = lin(ks[2], num_hid, out_channels)
    w2b, b2b = lin(ks[3], out_channels, out_channels)
    return dict(w1a=w1a, b1a=b1a, w1b=w1b, b1b=b1b,
                w2a=w2a, b2a=b2a, w2b=w2b, b2b=b2b)


if __name__ == "__main__":
    key = jax.random.PRNGKey(0)
    k_x1, k_p, k_e, k_x2 = jax.random.split(key, 4)

    IN_C, HID, OUT_C = 4, 16, 8
    params = init_params(k_p, IN_C, HID, OUT_C)

    def max_rel_err(a, b):
        return float(jnp.max(jnp.abs(a - b)) / (jnp.max(jnp.abs(b)) + 1e-6))

    # ---- test 1: small ring graph -> fused single-call path -----------------
    N1 = 16
    x1 = jax.random.normal(k_x1, (N1, IN_C), jnp.float32)
    s = jnp.arange(N1, dtype=jnp.int32)
    d = (s + 1) % N1
    edge_index1 = jnp.stack([jnp.concatenate([s, d]),
                             jnp.concatenate([d, s])], axis=0)      # [2, 2*N1]
    out1 = gin2_forward(x1, edge_index1, params)
    jax.block_until_ready(out1)
    assert out1.shape == (N1, OUT_C), out1.shape
    ref1 = gin2_reference(x1, edge_index1, params)
    err1 = max_rel_err(out1, ref1)
    assert err1 < 5e-2, f"fused path max-rel error {err1}"

    # ---- test 2: medium random graph -> tiled path (512 tiles, resident x/p) -
    N2, E2 = 2500, 10000
    x2 = jax.random.normal(k_x2, (N2, IN_C), jnp.float32)
    k_s, k_d = jax.random.split(k_e)
    src2 = jax.random.randint(k_s, (E2,), 0, N2, dtype=jnp.int32)
    dst2 = jax.random.randint(k_d, (E2,), 0, N2, dtype=jnp.int32)
    edge_index2 = jnp.stack([src2, dst2], axis=0)                   # [2, E2]
    out2 = gin2_forward(x2, edge_index2, params)
    jax.block_until_ready(out2)
    assert out2.shape == (N2, OUT_C), out2.shape
    ref2 = gin2_reference(x2, edge_index2, params)
    err2 = max_rel_err(out2, ref2)
    assert err2 < 5e-2, f"tiled path max-rel error {err2}"

    print("KERNEL_OK")
</pallas_src>

<mosaic_0001>
module attributes {stable_mosaic.version = 11 : i64} {
  func.func @gin2_fused_kernel(%arg0: memref<256x256xbf16, #tpu.memory_space<vmem>>, %arg1: memref<256x128xbf16, #tpu.memory_space<vmem>>, %arg2: memref<128x128xbf16, #tpu.memory_space<vmem>>, %arg3: memref<1x128xf32, #tpu.memory_space<vmem>>, %arg4: memref<128x128xbf16, #tpu.memory_space<vmem>>, %arg5: memref<1x128xf32, #tpu.memory_space<vmem>>, %arg6: memref<128x128xbf16, #tpu.memory_space<vmem>>, %arg7: memref<1x128xf32, #tpu.memory_space<vmem>>, %arg8: memref<128x128xbf16, #tpu.memory_space<vmem>>, %arg9: memref<1x128xf32, #tpu.memory_space<vmem>>, %arg10: memref<256x128xf32, #tpu.memory_space<vmem>>) attributes {dimension_semantics = [], scalar_prefetch = 0 : i64, scratch_operands = 0 : i64, tpu.core_type = #tpu.core_type<tc>} {
    %c0 = arith.constant 0 : index
    %c0_0 = arith.constant 0 : index
    %0 = vector.load %arg0[%c0, %c0_0] : memref<256x256xbf16, #tpu.memory_space<vmem>>, vector<256x256xbf16>
    %c0_1 = arith.constant 0 : index
    %c0_2 = arith.constant 0 : index
    %1 = vector.load %arg1[%c0_1, %c0_2] : memref<256x128xbf16, #tpu.memory_space<vmem>>, vector<256x128xbf16>
    %cst = arith.constant dense<0.000000e+00> : vector<256x128xf32>
    %2 = tpu.matmul %0, %1, %cst {dimension_numbers = #tpu.dot_dimension_numbers<[1], [0], [0], [1], [0, 0, 1, 1], [], []>} : vector<256x256xbf16>, vector<256x128xbf16>, vector<256x128xf32> -> vector<256x128xf32>
    %3 = arith.truncf %2 : vector<256x128xf32> to vector<256x128xbf16>
    %c0_3 = arith.constant 0 : index
    %c0_4 = arith.constant 0 : index
    %4 = vector.load %arg2[%c0_3, %c0_4] : memref<128x128xbf16, #tpu.memory_space<vmem>>, vector<128x128xbf16>
    %cst_5 = arith.constant dense<0.000000e+00> : vector<256x128xf32>
    %5 = tpu.matmul %3, %4, %cst_5 {dimension_numbers = #tpu.dot_dimension_numbers<[1], [0], [0], [1], [0, 0, 1, 1], [], []>} : vector<256x128xbf16>, vector<128x128xbf16>, vector<256x128xf32> -> vector<256x128xf32>
    %c0_6 = arith.constant 0 : index
    %c0_7 = arith.constant 0 : index
    %6 = vector.load %arg3[%c0_6, %c0_7] : memref<1x128xf32, #tpu.memory_space<vmem>>, vector<1x128xf32>
    %7 = vector.broadcast %6 : vector<1x128xf32> to vector<256x128xf32>
    %8 = arith.addf %5, %7 : vector<256x128xf32>
    %cst_8 = arith.constant 0.000000e+00 : f32
    %9 = vector.broadcast %cst_8 : f32 to vector<256x128xf32>
    %10 = arith.maximumf %8, %9 : vector<256x128xf32>
    %11 = arith.truncf %10 : vector<256x128xf32> to vector<256x128xbf16>
    %c0_9 = arith.constant 0 : index
    %c0_10 = arith.constant 0 : index
    %12 = vector.load %arg4[%c0_9, %c0_10] : memref<128x128xbf16, #tpu.memory_space<vmem>>, vector<128x128xbf16>
    %cst_11 = arith.constant dense<0.000000e+00> : vector<256x128xf32>
    %13 = tpu.matmul %11, %12, %cst_11 {dimension_numbers = #tpu.dot_dimension_numbers<[1], [0], [0], [1], [0, 0, 1, 1], [], []>} : vector<256x128xbf16>, vector<128x128xbf16>, vector<256x128xf32> -> vector<256x128xf32>
    %c0_12 = arith.constant 0 : index
    %c0_13 = arith.constant 0 : index
    %14 = vector.load %arg5[%c0_12, %c0_13] : memref<1x128xf32, #tpu.memory_space<vmem>>, vector<1x128xf32>
    %15 = vector.broadcast %14 : vector<1x128xf32> to vector<256x128xf32>
    %16 = arith.addf %13, %15 : vector<256x128xf32>
    %cst_14 = arith.constant 0.000000e+00 : f32
    %17 = vector.broadcast %cst_14 : f32 to vector<256x128xf32>
    %18 = arith.maximumf %16, %17 : vector<256x128xf32>
    %19 = arith.truncf %18 : vector<256x128xf32> to vector<256x128xbf16>
    %c0_15 = arith.constant 0 : index
    %c0_16 = arith.constant 0 : index
    %20 = vector.load %arg6[%c0_15, %c0_16] : memref<128x128xbf16, #tpu.memory_space<vmem>>, vector<128x128xbf16>
    %cst_17 = arith.constant dense<0.000000e+00> : vector<256x128xf32>
    %21 = tpu.matmul %19, %20, %cst_17 {dimension_numbers = #tpu.dot_dimension_numbers<[1], [0], [0], [1], [0, 0, 1, 1], [], []>} : vector<256x128xbf16>, vector<128x128xbf16>, vector<256x128xf32> -> vector<256x128xf32>
    %22 = arith.truncf %21 : vector<256x128xf32> to vector<256x128xbf16>
    %cst_18 = arith.constant dense<0.000000e+00> : vector<256x128xf32>
    %23 = tpu.matmul %0, %22, %cst_18 {dimension_numbers = #tpu.dot_dimension_numbers<[1], [0], [0], [1], [0, 0, 1, 1], [], []>} : vector<256x256xbf16>, vector<256x128xbf16>, vector<256x128xf32> -> vector<256x128xf32>
    %c0_19 = arith.constant 0 : index
    %c0_20 = arith.constant 0 : index
    %24 = vector.load %arg7[%c0_19, %c0_20] : memref<1x128xf32, #tpu.memory_space<vmem>>, vector<1x128xf32>
    %25 = vector.broadcast %24 : vector<1x128xf32> to vector<256x128xf32>
    %26 = arith.addf %23, %25 : vector<256x128xf32>
    %cst_21 = arith.constant 0.000000e+00 : f32
    %27 = vector.broadcast %cst_21 : f32 to vector<256x128xf32>
    %28 = arith.maximumf %26, %27 : vector<256x128xf32>
    %29 = arith.truncf %28 : vector<256x128xf32> to vector<256x128xbf16>
    %c0_22 = arith.constant 0 : index
    %c0_23 = arith.constant 0 : index
    %30 = vector.load %arg8[%c0_22, %c0_23] : memref<128x128xbf16, #tpu.memory_space<vmem>>, vector<128x128xbf16>
    %cst_24 = arith.constant dense<0.000000e+00> : vector<256x128xf32>
    %31 = tpu.matmul %29, %30, %cst_24 {dimension_numbers = #tpu.dot_dimension_numbers<[1], [0], [0], [1], [0, 0, 1, 1], [], []>} : vector<256x128xbf16>, vector<128x128xbf16>, vector<256x128xf32> -> vector<256x128xf32>
    %c0_25 = arith.constant 0 : index
    %c0_26 = arith.constant 0 : index
    %32 = vector.load %arg9[%c0_25, %c0_26] : memref<1x128xf32, #tpu.memory_space<vmem>>, vector<1x128xf32>
    %33 = vector.broadcast %32 : vector<1x128xf32> to vector<256x128xf32>
    %34 = arith.addf %31, %33 : vector<256x128xf32>
    %c0_27 = arith.constant 0 : index
    %c0_28 = arith.constant 0 : index
    %35 = vector.load %arg10[%c0_27, %c0_28] : memref<256x128xf32, #tpu.memory_space<vmem>>, vector<256x128xf32>
    tpu.vector_store %arg10[%c0_27, %c0_28], %34 {strides = array<i32>} : memref<256x128xf32, #tpu.memory_space<vmem>>, vector<256x128xf32>,
    return
  }
}

</mosaic_0001>

<bundles_post_ra>
// kernel: tpu_custom_call.1
= control target key start
LH: loop header
LB: loop body
LE: loop exit
PB: predicated region body
PF: predicated region fallthrough
CT: control target
= control target key end

     0   :  { %15 = vsyncpa [#allocation3], 0  ;;  %s3138_s0 = inlined_call_operand.hbm [shape: bf16[256,256], index: 0, kind: input, shape index: {}]   ;;  %s3139_s1 = inlined_call_operand.hbm [shape: bf16[256,128], index: 1, kind: input, shape index: {}]   ;;  %s3140_s2 = inlined_call_operand.hbm [shape: bf16[128,128], index: 2, kind: input, shape index: {}]   ;;  %s3141_s3 = inlined_call_operand.vmem [shape: f32[1,128], index: 3, kind: input, shape index: {}]   ;;  %s3142_s4 = inlined_call_operand.hbm [shape: bf16[128,128], index: 4, kind: input, shape index: {}]   ;;  %s3143_s5 = inlined_call_operand.vmem [shape: f32[1,128], index: 5, kind: input, shape index: {}]   ;;  %s3144_s6 = inlined_call_operand.hbm [shape: bf16[128,128], index: 6, kind: input, shape index: {}]   ;;  %s3145_s7 = inlined_call_operand.vmem [shape: f32[1,128], index: 7, kind: input, shape index: {}]   ;;  %s3146_s8 = inlined_call_operand.hbm [shape: bf16[128,128], index: 8, kind: input, shape index: {}]   ;;  %s3147_s9 = inlined_call_operand.vmem [shape: f32[1,128], index: 9, kind: input, shape index: {}]   ;;  %s3148_s10 = inlined_call_operand.hbm [shape: f32[256,128], index: 10, kind: output, shape index: {}]  }
   0x1   :  { %16 = vsyncpa [#allocation6], 0 }
   0x2   :  { %17 = vsyncpa [#allocation9], 0 }
   0x3   :  { %18 = vsyncpa [#allocation12], 0 }
   0x4   :  { %19 = vsyncpa [#allocation4], 0  ;;  %s2815_s13 = smov [#allocation5]   ;;  %s2651_s17 = scalar_lea.hbm %s3139_s1, 2048 }
   0x5   :  { %s37_s14 = sshll.u32 %s2815_s13, 4  ;;  %p2652_p0 = scmp.ne.s32.totalorder %s3139_s1, %s2651_s17  ;;  %s38_s14 = int_to_ptr.vmem [resolvable:$true] %s37_s14 }
   0x6   :  { %p2655_p1 = scmp.lt.u32.totalorder %s2651_s17, %s3139_s1 }
   0x8   :  { %p2657_p2 = pnand %p2655_p1, %p2652_p0 }
   0xa   :  { %2660 = shalt.err (!%p2657_p2)
}
   0xb   :  { %s2661_s22 = scalar_lea.vmem %s38_s14, 2048  ;;  %p2666_p4 = scmp.lt.s32.totalorder %s38_s14, %s38_s14 }
   0xc   :  { %p2662_p3 = scmp.ne.s32.totalorder %s38_s14, %s2661_s22  ;;  %p2667_p5 = scmp.lt.s32.totalorder %s2661_s22, %s2661_s22 }
   0xe   :  { %p2668_p6 = por %p2667_p5, %p2666_p4 }
  0x10   :  { %p2669_p7 = pnand %p2668_p6, %p2662_p3 }
  0x12   :  { %2672 = shalt.err (!%p2669_p7)
}
  0x13   :  { %s2816_s23 = smov 64   ;;  %s2817_s24 = smov 4  }
  0x14   :  { %43 = dma.hbm_to_vmem [thread:$0]  %s3139_s1, 2048, %s38_s14, [#allocation6], %s2816_s23, %s2816_s23, %s2817_s24  }
  0x15   :  { %s2818_s27 = smov [#allocation8]   ;;  %s2819_s29 = smov [#allocation2]  }
  0x16   :  { %s63_s28 = sshll.u32 %s2818_s27, 4  ;;  %s25_s30 = sshll.u32 %s2819_s29, 4  ;;  %s64_s28 = int_to_ptr.vmem [resolvable:$true] %s63_s28  ;;  %s26_s30 = int_to_ptr.vmem [resolvable:$true] %s25_s30 }
  0x17   :  { %s2673_s13 = scalar_lea.hbm %s3142_s4, 1024 }
  0x18   :  { %p2674_p8 = scmp.ne.s32.totalorder %s3142_s4, %s2673_s13  ;;  %p2677_p9 = scmp.lt.u32.totalorder %s2673_s13, %s3142_s4 }
  0x1a   :  { %p2679_p10 = pnand %p2677_p9, %p2674_p8 }
  0x1c   :  { %2682 = shalt.err (!%p2679_p10)
}
  0x1d   :  { %s2683_s1 = scalar_lea.vmem %s64_s28, 1024  ;;  %p2688_p12 = scmp.lt.s32.totalorder %s64_s28, %s64_s28 }
  0x1e   :  { %p2684_p11 = scmp.ne.s32.totalorder %s64_s28, %s2683_s1  ;;  %p2689_p13 = scmp.lt.s32.totalorder %s2683_s1, %s2683_s1 }
  0x20   :  { %p2690_p0 = por %p2689_p13, %p2688_p12 }
  0x22   :  { %p2691_p1 = pnand %p2690_p0, %p2684_p11 }
  0x24   :  { %2694 = shalt.err (!%p2691_p1)
}
  0x25   :  { %69 = dma.hbm_to_vmem [thread:$0]  %s3142_s4, 1024, %s64_s28, [#allocation9], %s2816_s23, %s2816_s23, %s2817_s24  }
  0x26   :  { %s2695_s22 = scalar_lea.hbm %s3138_s0, 4096 }
  0x27   :  { %p2696_p2 = scmp.ne.s32.totalorder %s3138_s0, %s2695_s22  ;;  %p2699_p3 = scmp.lt.u32.totalorder %s2695_s22, %s3138_s0 }
  0x29   :  { %p2701_p4 = pnand %p2699_p3, %p2696_p2 }
  0x2b   :  { %2704 = shalt.err (!%p2701_p4)
}
  0x2c   :  { %s2705_s11 = scalar_lea.vmem %s26_s30, 4096  ;;  %p2710_p6 = scmp.lt.s32.totalorder %s26_s30, %s26_s30 }
  0x2d   :  { %p2706_p5 = scmp.ne.s32.totalorder %s26_s30, %s2705_s11  ;;  %p2711_p7 = scmp.lt.s32.totalorder %s2705_s11, %s2705_s11 }
  0x2f   :  { %p2712_p8 = por %p2711_p7, %p2710_p6 }
  0x31   :  { %p2713_p9 = pnand %p2712_p8, %p2706_p5 }
  0x33   :  { %2716 = shalt.err (!%p2713_p9)
}
  0x34   :  { %s2820_s4 = smov 128   ;;  %s2821_s28 = smov 8  }
  0x35   :  { %31 = dma.hbm_to_vmem [thread:$0]  %s3138_s0, 4096, %s26_s30, [#allocation3], %s2820_s4, %s2820_s4, %s2821_s28  }
  0x36   :  { %s2822_s15 = smov [#allocation7]   ;;  %s2823_s17 = smov [#allocation10]  }
  0x37   :  { %s49_s16 = sshll.u32 %s2822_s15, 4  ;;  %s77_s18 = sshll.u32 %s2823_s17, 4  ;;  %s50_s16 = int_to_ptr.vmem [resolvable:$true] %s49_s16  ;;  %s78_s18 = int_to_ptr.vmem [resolvable:$true] %s77_s18 }
  0x38   :  { %s2717_s19 = scalar_lea.hbm %s3140_s2, 1024 }
  0x39   :  { %p2718_p10 = scmp.ne.s32.totalorder %s3140_s2, %s2717_s19  ;;  %p2721_p11 = scmp.lt.u32.totalorder %s2717_s19, %s3140_s2 }
  0x3b   :  { %p2723_p12 = pnand %p2721_p11, %p2718_p10 }
  0x3d   :  { %2726 = shalt.err (!%p2723_p12)
}
  0x3e   :  { %s2727_s0 = scalar_lea.vmem %s50_s16, 1024  ;;  %p2732_p0 = scmp.lt.s32.totalorder %s50_s16, %s50_s16 }
  0x3f   :  { %p2728_p13 = scmp.ne.s32.totalorder %s50_s16, %s2727_s0  ;;  %p2733_p1 = scmp.lt.s32.totalorder %s2727_s0, %s2727_s0 }
  0x41   :  { %p2734_p2 = por %p2733_p1, %p2732_p0 }
  0x43   :  { %p2735_p3 = pnand %p2734_p2, %p2728_p13 }
  0x45   :  { %2738 = shalt.err (!%p2735_p3)
}
  0x46   :  { %55 = dma.hbm_to_vmem [thread:$0]  %s3140_s2, 1024, %s50_s16, [#allocation6], %s2816_s23, %s2816_s23, %s2817_s24  }
  0x47   :  { %s2739_s11 = scalar_lea.hbm %s3144_s6, 1024 }
  0x48   :  { %p2740_p4 = scmp.ne.s32.totalorder %s3144_s6, %s2739_s11  ;;  %p2743_p5 = scmp.lt.u32.totalorder %s2739_s11, %s3144_s6 }
  0x4a   :  { %p2745_p6 = pnand %p2743_p5, %p2740_p4 }
  0x4c   :  { %2748 = shalt.err (!%p2745_p6)
}
  0x4d   :  { %s2749_s1 = scalar_lea.vmem %s78_s18, 1024  ;;  %p2754_p8 = scmp.lt.s32.totalorder %s78_s18, %s78_s18 }
  0x4e   :  { %p2750_p7 = scmp.ne.s32.totalorder %s78_s18, %s2749_s1  ;;  %p2755_p9 = scmp.lt.s32.totalorder %s2749_s1, %s2749_s1 }
  0x50   :  { %p2756_p10 = por %p2755_p9, %p2754_p8 }
  0x52   :  { %p2757_p11 = pnand %p2756_p10, %p2750_p7 }
  0x54   :  { %2760 = shalt.err (!%p2757_p11)
}
  0x55   :  { %83 = dma.hbm_to_vmem [thread:$0]  %s3144_s6, 1024, %s78_s18, [#allocation9], %s2816_s23, %s2816_s23, %s2817_s24  }
  0x56   :  { %s2824_s14 = smov [#allocation11]   ;;  %s2761_s22 = scalar_lea.hbm %s3146_s8, 1024 }
  0x57   :  { %s91_s19 = sshll.u32 %s2824_s14, 4  ;;  %p2762_p12 = scmp.ne.s32.totalorder %s3146_s8, %s2761_s22  ;;  %s92_s19 = int_to_ptr.vmem [resolvable:$true] %s91_s19 }
  0x58   :  { %p2765_p13 = scmp.lt.u32.totalorder %s2761_s22, %s3146_s8 }
  0x5a   :  { %p2767_p0 = pnand %p2765_p13, %p2762_p12 }
  0x5c   :  { %2770 = shalt.err (!%p2767_p0)
}
  0x5d   :  { %s2771_s27 = scalar_lea.vmem %s92_s19, 1024  ;;  %p2776_p2 = scmp.lt.s32.totalorder %s92_s19, %s92_s19 }
  0x5e   :  { %p2772_p1 = scmp.ne.s32.totalorder %s92_s19, %s2771_s27  ;;  %p2777_p3 = scmp.lt.s32.totalorder %s2771_s27, %s2771_s27 }
  0x60   :  { %p2778_p4 = por %p2777_p3, %p2776_p2 }
  0x62   :  { %p2779_p5 = pnand %p2778_p4, %p2772_p1 }
  0x64   :  { %2782 = shalt.err (!%p2779_p5)
}
  0x65   :  { %97 = dma.hbm_to_vmem [thread:$0]  %s3146_s8, 1024, %s92_s19, [#allocation12], %s2816_s23, %s2816_s23, %s2817_s24  }
  0x66   :  { %2805 = dma.done.wait [#allocation3], 4096  }
  0x67   :  { %2806 = vsyncadd [#allocation3], 4294963200 }
  0x68   :  { %2807 = dma.done.wait [#allocation6], 3072  }
  0x69   :  { %2808 = vsyncadd [#allocation6], 4294964224 }
  0x6a   :  { %2809 = dma.done.wait [#allocation9], 2048  }
  0x6b   :  { %2810 = vsyncadd [#allocation9], 4294965248 }
  0x6c   :  { %2811 = dma.done.wait [#allocation12], 1024  }
  0x6d   :  { %2812 = vsyncadd [#allocation12], 4294966272  ;;  %v2524_v0 = vld [vmem:[#allocation5 + $0x40] sm:$0xff]   ;;  %v2526_v2 = vld [vmem:[#allocation5 + $0x48] sm:$0xff]  }
  0x6e   :  { %v2525_v1 = vld [vmem:[#allocation5] sm:$0xff]   ;;  %2001 = vmatprep.subr.bf16.mxu0 %v2524_v0  ;;  %v2527_v3 = vld [vmem:[#allocation5 + $0x8] sm:$0xff]   ;;  %v2528_v4 = vld [vmem:[#allocation5 + $0x50] sm:$0xff]  }
  0x6f   :  { %2002 = vmatpush3.bf16.msra.mxu0 %v2525_v1  ;;  %v2529_v5 = vld [vmem:[#allocation5 + $0x10] sm:$0xff]   ;;  %v2530_v6 = vld [vmem:[#allocation5 + $0x58] sm:$0xff]   ;;  %v2532_v8 = vld [vmem:[#allocation5 + $0x60] sm:$0xff]  }
  0x70   :  { %2003 = vmatprep.subr.bf16.mxu0 %v2526_v2  ;;  %v2531_v7 = vld [vmem:[#allocation5 + $0x18] sm:$0xff]   ;;  %v2533_v9 = vld [vmem:[#allocation5 + $0x20] sm:$0xff]   ;;  %v2534_v10 = vld [vmem:[#allocation5 + $0x68] sm:$0xff]  }
  0x71   :  { %v2971_v11 = vld [vmem:[#allocation2 + $0x4] ss:$8 sps:$4 sm:$0xff]   ;;  %v2536_v13 = vld [vmem:[#allocation5 + $0x70] sm:$0xff]   ;;  %v2538_v15 = vld [vmem:[#allocation5 + $0x78] sm:$0xff]  }
  0x72   :  { %v2535_v12 = vld [vmem:[#allocation5 + $0x28] sm:$0xff]   ;;  %471 = vmatprep.mubr.bf16.mxu0 %v2971_v11  ;;  %v2537_v14 = vld [vmem:[#allocation5 + $0x30] sm:$0xff]   ;;  %v2539_v16 = vld [vmem:[#allocation5 + $0x38] sm:$0xff]  }
  0x73   :  { %2004 = vmatpush3.bf16.msra.mxu0 %v2527_v3  ;;  %v2540_v17 = vld [vmem:[#allocation2] ss:$8 sps:$4 sm:$0xff]   ;;  %v2543_v18 = vld [vmem:[#allocation2 + $0x14] ss:$8 sps:$4 sm:$0xff]   ;;  %v2545_v19 = vld [vmem:[#allocation2 + $0x10] ss:$8 sps:$4 sm:$0xff]  }
  0x74   :  { %2005 = vmatprep.subr.bf16.mxu0 %v2528_v4  ;;  %v2546_v20 = vld [vmem:[#allocation2 + $0x24] ss:$8 sps:$4 sm:$0xff]   ;;  %v2590_v23 = vld [vmem:[#allocation7 + $0x10] sm:$0xff]   ;;  %v2548_v24 = vld [vmem:[#allocation2 + $0x20] ss:$8 sps:$4 sm:$0xff]  }
  0x75   :  { %v2588_v21 = vld [vmem:[#allocation7] sm:$0xff]   ;;  %v2589_v22 = vld [vmem:[#allocation7 + $0x8] sm:$0xff]   ;;  %v2591_v25 = vld [vmem:[#allocation7 + $0x18] sm:$0xff]  }
  0x76   :  { %2321 = vmatprep.subr.bf16.mxu1 %v2588_v21  ;;  %v2549_v26 = vld [vmem:[#allocation2 + $0x34] ss:$8 sps:$4 sm:$0xff]   ;;  %v2551_v27 = vld [vmem:[#allocation2 + $0x30] ss:$8 sps:$4 sm:$0xff]   ;;  %v2552_v28 = vld [vmem:[#allocation2 + $0x44] ss:$8 sps:$4 sm:$0xff]  }
  0x77   :  { %2006 = vmatpush3.bf16.msra.mxu0 %v2529_v5  ;;  %2322 = vmatpush3.bf16.msra.mxu1 %v2588_v21  ;;  %v2554_v29 = vld [vmem:[#allocation2 + $0x40] ss:$8 sps:$4 sm:$0xff]   ;;  %v2555_v30 = vld [vmem:[#allocation2 + $0x54] ss:$8 sps:$4 sm:$0xff]   ;;  %v2557_v31 = vld [vmem:[#allocation2 + $0x50] ss:$8 sps:$4 sm:$0xff]  }
  0x78   :  { %2007 = vmatprep.subr.bf16.mxu0 %v2530_v6  ;;  %2323 = vmatprep.subr.bf16.mxu1 %v2589_v22  ;;  %v2558_v32 = vld [vmem:[#allocation2 + $0x64] ss:$8 sps:$4 sm:$0xff]   ;;  %v2560_v33 = vld [vmem:[#allocation2 + $0x60] ss:$8 sps:$4 sm:$0xff]   ;;  %v2561_v34 = vld [vmem:[#allocation2 + $0x74] ss:$8 sps:$4 sm:$0xff]  }
  0x79   :  { %v2563_v35 = vld [vmem:[#allocation2 + $0x70] ss:$8 sps:$4 sm:$0xff]   ;;  %v2564_v36 = vld [vmem:[#allocation2 + $0x84] ss:$8 sps:$4 sm:$0xff]   ;;  %v2566_v37 = vld [vmem:[#allocation2 + $0x80] ss:$8 sps:$4 sm:$0xff]  }
  0x7a   :  { %v2567_v38 = vld [vmem:[#allocation2 + $0x94] ss:$8 sps:$4 sm:$0xff]   ;;  %v2569_v39 = vld [vmem:[#allocation2 + $0x90] ss:$8 sps:$4 sm:$0xff]   ;;  %v2570_v40 = vld [vmem:[#allocation2 + $0xa4] ss:$8 sps:$4 sm:$0xff]  }
  0x7b   :  { %2008 = vmatpush3.bf16.msra.mxu0 %v2531_v7  ;;  %2324 = vmatpush3.bf16.msra.mxu1 %v2589_v22  ;;  %v2572_v41 = vld [vmem:[#allocation2 + $0xa0] ss:$8 sps:$4 sm:$0xff]   ;;  %v2573_v42 = vld [vmem:[#allocation2 + $0xb4] ss:$8 sps:$4 sm:$0xff]   ;;  %v2575_v44 = vld [vmem:[#allocation2 + $0xb0] ss:$8 sps:$4 sm:$0xff]  }
  0x7c   :  { %2009 = vmatprep.subr.bf16.mxu0 %v2532_v8  ;;  %2325 = vmatprep.subr.bf16.mxu1 %v2590_v23  ;;  %v2592_v43 = vld [vmem:[#allocation7 + $0x20] sm:$0xff]   ;;  %v2593_v46 = vld [vmem:[#allocation7 + $0x28] sm:$0xff]   ;;  %v2594_v47 = vld [vmem:[#allocation7 + $0x30] sm:$0xff]  }
  0x7d   :  { %v2576_v45 = vld [vmem:[#allocation2 + $0xc4] ss:$8 sps:$4 sm:$0xff]   ;;  %v2578_v48 = vld [vmem:[#allocation2 + $0xc0] ss:$8 sps:$4 sm:$0xff]   ;;  %v2579_v49 = vld [vmem:[#allocation2 + $0xd4] ss:$8 sps:$4 sm:$0xff]  }
  0x7e   :  { %v2595_v50 = vld [vmem:[#allocation7 + $0x38] sm:$0xff]   ;;  %v2582_v52 = vld [vmem:[#allocation2 + $0xe4] ss:$8 sps:$4 sm:$0xff]   ;;  %v2584_v53 = vld [vmem:[#allocation2 + $0xe0] ss:$8 sps:$4 sm:$0xff]  }
  0x7f   :  { %2010 = vmatpush3.bf16.msra.mxu0 %v2533_v9  ;;  %2326 = vmatpush3.bf16.msra.mxu1 %v2590_v23  ;;  %v2581_v51 = vld [vmem:[#allocation2 + $0xd0] ss:$8 sps:$4 sm:$0xff]   ;;  %v2585_v54 = vld [vmem:[#allocation2 + $0xf4] ss:$8 sps:$4 sm:$0xff]   ;;  %v2596_v57 = vld [vmem:[#allocation8] sm:$0xff]  }
  0x80   :  { %2011 = vmatprep.subr.bf16.mxu0 %v2534_v10  ;;  %2327 = vmatprep.subr.bf16.mxu1 %v2591_v25  ;;  %v2587_v55 = vld [vmem:[#allocation2 + $0xf0] ss:$8 sps:$4 sm:$0xff]   ;;  %v2597_v7 = vld [vmem:[#allocation8 + $0x8] sm:$0xff]   ;;  %v2600_v22 = vld [vmem:[#allocation8 + $0x20] sm:$0xff]  }
  0x83   :  { %2012 = vmatpush3.bf16.msra.mxu0 %v2535_v12  ;;  %2328 = vmatpush3.bf16.msra.mxu1 %v2591_v25 }
  0x84   :  { %2013 = vmatprep.subr.bf16.mxu0 %v2536_v13  ;;  %2329 = vmatprep.subr.bf16.mxu1 %v2592_v43  ;;  %v2598_v13 = vld [vmem:[#allocation8 + $0x10] sm:$0xff]  }
  0x87   :  { %2014 = vmatpush3.bf16.msra.mxu0 %v2537_v14  ;;  %2330 = vmatpush3.bf16.msra.mxu1 %v2592_v43 }
  0x88   :  { %2015 = vmatprep.subr.bf16.mxu0 %v2538_v15  ;;  %2331 = vmatprep.subr.bf16.mxu1 %v2593_v46 }
  0x8b   :  { %2016 = vmatpush3.bf16.msra.mxu0 %v2539_v16  ;;  %2332 = vmatpush3.bf16.msra.mxu1 %v2593_v46 }
  0x8c   :  { %2333 = vmatprep.subr.bf16.mxu1 %v2594_v47 }
  0x8e   :  { %472 = vmatmul.mubr.bf16.vlgmr.msra.gmra.mrb[0].mxu0 %v2540_v17  ;;  %v2599_v17 = vld [vmem:[#allocation8 + $0x18] sm:$0xff]  }
  0x8f   :  { %479 = vmatprep.mubr.bf16.mxu0 %v2543_v18  ;;  %2334 = vmatpush3.bf16.msra.mxu1 %v2594_v47 }
  0x90   :  { %2335 = vmatprep.subr.bf16.mxu1 %v2595_v50 }
  0x93   :  { %2336 = vmatpush3.bf16.msra.mxu1 %v2595_v50 }
  0x94   :  { %2369 = vmatprep.subr.bf16.mxu1 %v2596_v57 }
  0x96   :  { %480 = vmatmul.mubr.bf16.gmra.mrb[4].mxu0 %v2545_v19 }
  0x97   :  { %487 = vmatprep.mubr.bf16.mxu0 %v2546_v20 }
  0x9e   :  { %488 = vmatmul.mubr.bf16.gmra.mrb[8].mxu0 %v2548_v24 }
  0x9f   :  { %495 = vmatprep.mubr.bf16.mxu0 %v2549_v26  ;;  %v2601_v26 = vld [vmem:[#allocation8 + $0x28] sm:$0xff]  }
  0xa6   :  { %496 = vmatmul.mubr.bf16.gmra.mrb[12].mxu0 %v2551_v27 }
  0xa7   :  { %503 = vmatprep.mubr.bf16.mxu0 %v2552_v28 }
  0xae   :  { %504 = vmatmul.mubr.bf16.gmra.mrb[16].mxu0 %v2554_v29 }
  0xaf   :  { %511 = vmatprep.mubr.bf16.mxu0 %v2555_v30 }
  0xb6   :  { %512 = vmatmul.mubr.bf16.gmra.mrb[20].mxu0 %v2557_v31 }
  0xb7   :  { %519 = vmatprep.mubr.bf16.mxu0 %v2558_v32 }
  0xbe   :  { %520 = vmatmul.mubr.bf16.gmra.mrb[24].mxu0 %v2560_v33 }
  0xbf   :  { %527 = vmatprep.mubr.bf16.mxu0 %v2561_v34 }
  0xc6   :  { %528 = vmatmul.mubr.bf16.gmra.mrb[28].mxu0 %v2563_v35 }
  0xc7   :  { %535 = vmatprep.mubr.bf16.mxu0 %v2564_v36 }
  0xce   :  { %536 = vmatmul.mubr.bf16.gmra.mrb[32].mxu0 %v2566_v37 }
  0xcf   :  { %543 = vmatprep.mubr.bf16.mxu0 %v2567_v38 }
  0xd6   :  { %544 = vmatmul.mubr.bf16.gmra.mrb[36].mxu0 %v2569_v39 }
  0xd7   :  { %551 = vmatprep.mubr.bf16.mxu0 %v2570_v40 }
  0xde   :  { %552 = vmatmul.mubr.bf16.gmra.mrb[40].mxu0 %v2572_v41 }
  0xdf   :  { %559 = vmatprep.mubr.bf16.mxu0 %v2573_v42 }
  0xe6   :  { %560 = vmatmul.mubr.bf16.gmra.mrb[44].mxu0 %v2575_v44 }
  0xe7   :  { %567 = vmatprep.mubr.bf16.mxu0 %v2576_v45 }
  0xee   :  { %568 = vmatmul.mubr.bf16.gmra.mrb[48].mxu0 %v2578_v48 }
  0xef   :  { %575 = vmatprep.mubr.bf16.mxu0 %v2579_v49 }
  0xf6   :  { %576 = vmatmul.mubr.bf16.gmra.mrb[52].mxu0 %v2581_v51 }
  0xf7   :  { %583 = vmatprep.mubr.bf16.mxu0 %v2582_v52 }
  0xfe   :  { %584 = vmatmul.mubr.bf16.gmra.mrb[56].mxu0 %v2584_v53 }
  0xff   :  { %591 = vmatprep.mubr.bf16.mxu0 %v2585_v54 }
 0x106   :  { %592 = vmatmul.mubr.bf16.gmra.mrb[60].mxu0 %v2587_v55 }
 0x161   :  { %v2017_v56 = vpop.f32.mrb[0].mxu0 }
 0x162   :  { %v2018_v58 = vpop.f32.mrb[1].mxu0 }
 0x163   :  { %v2019_v59 = vadd.f32 %v2018_v58, %v2017_v56  ;;  %v2020_v60 = vpop.f32.mrb[2].mxu0 }
 0x164   :  { %v2021_v61 = vpop.f32.mrb[3].mxu0 }
 0x165   :  { %v2022_v62 = vadd.f32 %v2021_v61, %v2020_v60 }
 0x167   :  { %v600_v63 = vpack.c.bf16 %v2022_v62, %v2019_v59 }
 0x169   :  { %v2023_v0 = vpop.f32.mrb[4].mxu0  ;;  %2337 = vmatprep.mubr.bf16.mxu1 %v600_v63 }
 0x16a   :  { %v2024_v1 = vpop.f32.mrb[5].mxu0 }
 0x16b   :  { %v2025_v2 = vadd.f32 %v2024_v1, %v2023_v0  ;;  %v2026_v3 = vpop.f32.mrb[6].mxu0 }
 0x16c   :  { %v2027_v4 = vpop.f32.mrb[7].mxu0 }
 0x16d   :  { %v2028_v5 = vadd.f32 %v2027_v4, %v2026_v3 }
 0x16f   :  { %v601_v6 = vpack.c.bf16 %v2028_v5, %v2025_v2 }
 0x171   :  { %v2029_v8 = vpop.f32.mrb[8].mxu0  ;;  %2338 = vmatmul.mubr.bf16.vlgmr.msra.gmra.mrb[0].mxu1 %v601_v6 }
 0x172   :  { %v2030_v9 = vpop.f32.mrb[9].mxu0  ;;  %2370 = vmatpush3.bf16.msra.mxu1 %v2596_v57 }
 0x173   :  { %v2031_v10 = vadd.f32 %v2030_v9, %v2029_v8  ;;  %v2032_v12 = vpop.f32.mrb[10].mxu0  ;;  %2371 = vmatprep.subr.bf16.mxu1 %v2597_v7 }
 0x174   :  { %v2033_v14 = vpop.f32.mrb[11].mxu0 }
 0x175   :  { %v2034_v15 = vadd.f32 %v2033_v14, %v2032_v12 }
 0x176   :  { %2372 = vmatpush3.bf16.msra.mxu1 %v2597_v7 }
 0x177   :  { %v602_v16 = vpack.c.bf16 %v2034_v15, %v2031_v10  ;;  %2373 = vmatprep.subr.bf16.mxu1 %v2598_v13 }
 0x179   :  { %v2035_v18 = vpop.f32.mrb[12].mxu0  ;;  %2341 = vmatprep.mubr.bf16.mxu1 %v602_v16 }
 0x17a   :  { %v2036_v19 = vpop.f32.mrb[13].mxu0  ;;  %2374 = vmatpush3.bf16.msra.mxu1 %v2598_v13 }
 0x17b   :  { %v2037_v20 = vadd.f32 %v2036_v19, %v2035_v18  ;;  %v2038_v21 = vpop.f32.mrb[14].mxu0  ;;  %2375 = vmatprep.subr.bf16.mxu1 %v2599_v17 }
 0x17c   :  { %v2039_v23 = vpop.f32.mrb[15].mxu0 }
 0x17d   :  { %v2040_v24 = vadd.f32 %v2039_v23, %v2038_v21 }
 0x17e   :  { %2376 = vmatpush3.bf16.msra.mxu1 %v2599_v17 }
 0x17f   :  { %v603_v25 = vpack.c.bf16 %v2040_v24, %v2037_v20  ;;  %2377 = vmatprep.subr.bf16.mxu1 %v2600_v22 }
 0x181   :  { %v2041_v27 = vpop.f32.mrb[16].mxu0  ;;  %2342 = vmatmul.mubr.bf16.gmra.mrb[4].mxu1 %v603_v25 }
 0x182   :  { %v2042_v28 = vpop.f32.mrb[17].mxu0  ;;  %2378 = vmatpush3.bf16.msra.mxu1 %v2600_v22 }
 0x183   :  { %v2043_v29 = vadd.f32 %v2042_v28, %v2041_v27  ;;  %v2044_v30 = vpop.f32.mrb[18].mxu0  ;;  %2379 = vmatprep.subr.bf16.mxu1 %v2601_v26 }
 0x184   :  { %v2045_v31 = vpop.f32.mrb[19].mxu0 }
 0x185   :  { %v2046_v32 = vadd.f32 %v2045_v31, %v2044_v30 }
 0x186   :  { %2380 = vmatpush3.bf16.msra.mxu1 %v2601_v26  ;;  %v2602_v26 = vld [vmem:[#allocation8 + $0x30] sm:$0xff]  }
 0x187   :  { %v604_v33 = vpack.c.bf16 %v2046_v32, %v2043_v29  ;;  %2381 = vmatprep.subr.bf16.mxu1 %v2602_v26  ;;  %v2603_v29 = vld [vmem:[#allocation8 + $0x38] sm:$0xff]  }
 0x189   :  { %v2047_v34 = vpop.f32.mrb[20].mxu0  ;;  %2345 = vmatprep.mubr.bf16.mxu1 %v604_v33 }
 0x18a   :  { %v2048_v35 = vpop.f32.mrb[21].mxu0  ;;  %2382 = vmatpush3.bf16.msra.mxu1 %v2602_v26 }
 0x18b   :  { %v2049_v36 = vadd.f32 %v2048_v35, %v2047_v34  ;;  %v2050_v37 = vpop.f32.mrb[22].mxu0  ;;  %2383 = vmatprep.subr.bf16.mxu1 %v2603_v29 }
 0x18c   :  { %v2051_v38 = vpop.f32.mrb[23].mxu0 }
 0x18d   :  { %v2052_v39 = vadd.f32 %v2051_v38, %v2050_v37 }
 0x18e   :  { %2384 = vmatpush3.bf16.msra.mxu1 %v2603_v29 }
 0x18f   :  { %v605_v40 = vpack.c.bf16 %v2052_v39, %v2049_v36 }
 0x191   :  { %v2053_v41 = vpop.f32.mrb[24].mxu0  ;;  %2346 = vmatmul.mubr.bf16.gmra.mrb[8].mxu1 %v605_v40 }
 0x192   :  { %v2054_v42 = vpop.f32.mrb[25].mxu0 }
 0x193   :  { %v2055_v43 = vadd.f32 %v2054_v42, %v2053_v41  ;;  %v2056_v44 = vpop.f32.mrb[26].mxu0 }
 0x194   :  { %v2057_v45 = vpop.f32.mrb[27].mxu0 }
 0x195   :  { %v2058_v46 = vadd.f32 %v2057_v45, %v2056_v44 }
 0x197   :  { %v606_v47 = vpack.c.bf16 %v2058_v46, %v2055_v43 }
 0x199   :  { %v2059_v48 = vpop.f32.mrb[28].mxu0  ;;  %2349 = vmatprep.mubr.bf16.mxu1 %v606_v47 }
 0x19a   :  { %v2060_v49 = vpop.f32.mrb[29].mxu0 }
 0x19b   :  { %v2061_v50 = vadd.f32 %v2060_v49, %v2059_v48  ;;  %v2062_v51 = vpop.f32.mrb[30].mxu0 }
 0x19c   :  { %v2063_v52 = vpop.f32.mrb[31].mxu0 }
 0x19d   :  { %v2064_v53 = vadd.f32 %v2063_v52, %v2062_v51  ;;  %v2605_v51 = vld [vmem:[#allocation10 + $0x8] sm:$0xff]   ;;  %v2977_v52 = vld [vmem:[%s3141_s3] ss:$0 sm:$0xff] }
 0x19f   :  { %v607_v54 = vpack.c.bf16 %v2064_v53, %v2061_v50  ;;  %v2604_v50 = vld [vmem:[#allocation10] sm:$0xff]   ;;  %v2606_v53 = vld [vmem:[#allocation10 + $0x10] sm:$0xff]  }
 0x1a0   :  { %2417 = vmatprep.subr.bf16.mxu0 %v2604_v50 }
 0x1a1   :  { %v2065_v55 = vpop.f32.mrb[32].mxu0  ;;  %2350 = vmatmul.mubr.bf16.gmra.mrb[12].mxu1 %v607_v54  ;;  %2418 = vmatpush3.bf16.msra.mxu0 %v2604_v50 }
 0x1a2   :  { %v2066_v56 = vpop.f32.mrb[33].mxu0  ;;  %2419 = vmatprep.subr.bf16.mxu0 %v2605_v51 }
 0x1a3   :  { %v2067_v57 = vadd.f32 %v2066_v56, %v2065_v55  ;;  %v2068_v58 = vpop.f32.mrb[34].mxu0 }
 0x1a4   :  { %v2069_v59 = vpop.f32.mrb[35].mxu0 }
 0x1a5   :  { %v2070_v60 = vadd.f32 %v2069_v59, %v2068_v58  ;;  %2420 = vmatpush3.bf16.msra.mxu0 %v2605_v51 }
 0x1a6   :  { %2421 = vmatprep.subr.bf16.mxu0 %v2606_v53 }
 0x1a7   :  { %v608_v61 = vpack.c.bf16 %v2070_v60, %v2067_v57 }
 0x1a9   :  { %v2071_v62 = vpop.f32.mrb[36].mxu0  ;;  %2353 = vmatprep.mubr.bf16.mxu1 %v608_v61  ;;  %v2607_v61 = vld [vmem:[#allocation10 + $0x18] sm:$0xff]   ;;  %2422 = vmatpush3.bf16.msra.mxu0 %v2606_v53 }
 0x1aa   :  { %v2072_v63 = vpop.f32.mrb[37].mxu0  ;;  %2423 = vmatprep.subr.bf16.mxu0 %v2607_v61 }
 0x1ab   :  { %v2073_v0 = vadd.f32 %v2072_v63, %v2071_v62  ;;  %v2074_v1 = vpop.f32.mrb[38].mxu0 }
 0x1ac   :  { %v2075_v2 = vpop.f32.mrb[39].mxu0 }
 0x1ad   :  { %v2076_v3 = vadd.f32 %v2075_v2, %v2074_v1  ;;  %2424 = vmatpush3.bf16.msra.mxu0 %v2607_v61 }
 0x1af   :  { %v609_v4 = vpack.c.bf16 %v2076_v3, %v2073_v0 }
 0x1b1   :  { %v2077_v5 = vpop.f32.mrb[40].mxu0  ;;  %2354 = vmatmul.mubr.bf16.gmra.mrb[16].mxu1 %v609_v4  ;;  %v2608_v4 = vld [vmem:[#allocation10 + $0x20] sm:$0xff]  }
 0x1b2   :  { %v2078_v6 = vpop.f32.mrb[41].mxu0  ;;  %2425 = vmatprep.subr.bf16.mxu0 %v2608_v4 }
 0x1b3   :  { %v2079_v7 = vadd.f32 %v2078_v6, %v2077_v5  ;;  %v2080_v8 = vpop.f32.mrb[42].mxu0  ;;  %v2609_v6 = vld [vmem:[#allocation10 + $0x28] sm:$0xff]   ;;  %2426 = vmatpush3.bf16.msra.mxu0 %v2608_v4 }
 0x1b4   :  { %v2081_v9 = vpop.f32.mrb[43].mxu0  ;;  %2427 = vmatprep.subr.bf16.mxu0 %v2609_v6 }
 0x1b5   :  { %v2082_v10 = vadd.f32 %v2081_v9, %v2080_v8 }
 0x1b7   :  { %v610_v12 = vpack.c.bf16 %v2082_v10, %v2079_v7  ;;  %2428 = vmatpush3.bf16.msra.mxu0 %v2609_v6 }
 0x1b9   :  { %v2083_v13 = vpop.f32.mrb[44].mxu0  ;;  %2357 = vmatprep.mubr.bf16.mxu1 %v610_v12 }
 0x1ba   :  { %v2084_v14 = vpop.f32.mrb[45].mxu0 }
 0x1bb   :  { %v2085_v15 = vadd.f32 %v2084_v14, %v2083_v13  ;;  %v2086_v16 = vpop.f32.mrb[46].mxu0 }
 0x1bc   :  { %v2087_v17 = vpop.f32.mrb[47].mxu0 }
 0x1bd   :  { %v2088_v18 = vadd.f32 %v2087_v17, %v2086_v16 }
 0x1bf   :  { %v611_v19 = vpack.c.bf16 %v2088_v18, %v2085_v15 }
 0x1c1   :  { %v2089_v20 = vpop.f32.mrb[48].mxu0  ;;  %2358 = vmatmul.mubr.bf16.gmra.mrb[20].mxu1 %v611_v19 }
 0x1c2   :  { %v2090_v21 = vpop.f32.mrb[49].mxu0 }
 0x1c3   :  { %v2091_v22 = vadd.f32 %v2090_v21, %v2089_v20  ;;  %v2092_v23 = vpop.f32.mrb[50].mxu0 }
 0x1c4   :  { %v2093_v24 = vpop.f32.mrb[51].mxu0 }
 0x1c5   :  { %v2094_v25 = vadd.f32 %v2093_v24, %v2092_v23 }
 0x1c7   :  { %v612_v27 = vpack.c.bf16 %v2094_v25, %v2091_v22 }
 0x1c9   :  { %v2095_v28 = vpop.f32.mrb[52].mxu0  ;;  %2361 = vmatprep.mubr.bf16.mxu1 %v612_v27 }
 0x1ca   :  { %v2096_v30 = vpop.f32.mrb[53].mxu0 }
 0x1cb   :  { %v2097_v31 = vadd.f32 %v2096_v30, %v2095_v28  ;;  %v2098_v32 = vpop.f32.mrb[54].mxu0 }
 0x1cc   :  { %v2099_v33 = vpop.f32.mrb[55].mxu0 }
 0x1cd   :  { %v2100_v34 = vadd.f32 %v2099_v33, %v2098_v32 }
 0x1cf   :  { %v613_v35 = vpack.c.bf16 %v2100_v34, %v2097_v31 }
 0x1d1   :  { %v2101_v36 = vpop.f32.mrb[56].mxu0  ;;  %2362 = vmatmul.mubr.bf16.gmra.mrb[24].mxu1 %v613_v35 }
 0x1d2   :  { %v2102_v37 = vpop.f32.mrb[57].mxu0 }
 0x1d3   :  { %v2103_v38 = vadd.f32 %v2102_v37, %v2101_v36  ;;  %v2104_v39 = vpop.f32.mrb[58].mxu0 }
 0x1d4   :  { %v2105_v40 = vpop.f32.mrb[59].mxu0 }
 0x1d5   :  { %v2106_v41 = vadd.f32 %v2105_v40, %v2104_v39 }
 0x1d7   :  { %v614_v42 = vpack.c.bf16 %v2106_v41, %v2103_v38 }
 0x1d9   :  { %v2107_v43 = vpop.f32.mrb[60].mxu0  ;;  %2365 = vmatprep.mubr.bf16.mxu1 %v614_v42 }
 0x1da   :  { %v2108_v44 = vpop.f32.mrb[61].mxu0 }
 0x1db   :  { %v2109_v45 = vadd.f32 %v2108_v44, %v2107_v43  ;;  %v2110_v46 = vpop.f32.mrb[62].mxu0 }
 0x1dc   :  { %v2111_v47 = vpop.f32.mrb[63].mxu0 }
 0x1dd   :  { %v2112_v48 = vadd.f32 %v2111_v47, %v2110_v46 }
 0x1df   :  { %v615_v49 = vpack.c.bf16 %v2112_v48, %v2109_v45 }
 0x1e1   :  { %2366 = vmatmul.mubr.bf16.gmra.mrb[28].mxu1 %v615_v49 }
 0x244   :  { %v2339_v54 = vpop.f32.mrb[0].mxu1 }
 0x245   :  { %v730_v55 = vadd.f32 %v2339_v54, %v2977_v52  ;;  %v721_v56 = vpop.f32.mrb[1].mxu1 }
 0x246   :  { %v722_v57 = vadd.f32 %v2977_v52, %v721_v56  ;;  %v2340_v58 = vpop.f32.mrb[2].mxu1 }
 0x247   :  { %v733_v59 = vadd.f32 %v2340_v58, %v2977_v52  ;;  %v724_v60 = vpop.f32.mrb[3].mxu1  ;;  %v850_v63 = vmax.f32 %v730_v55, 0.0 }
 0x248   :  { %v725_v62 = vadd.f32 %v2977_v52, %v724_v60  ;;  %v848_v1 = vmax.f32 %v722_v57, 0.0 }
 0x249   :  { %v851_v0 = vmax.f32 %v733_v59, 0.0 }
 0x24a   :  { %v849_v2 = vmax.f32 %v725_v62, 0.0 }
 0x24b   :  { %v881_v3 = vpack.c.bf16 %v851_v0, %v850_v63 }
 0x24c   :  { %v880_v5 = vpack.c.bf16 %v849_v2, %v848_v1 }
 0x24e   :  { %2385 = vmatprep.mubr.bf16.mxu1 %v880_v5 }
 0x24f   :  { %2386 = vmatmul.mubr.bf16.vlgmr.msra.gmra.mrb[32].mxu1 %v881_v3 }
 0x254   :  { %v2343_v7 = vpop.f32.mrb[4].mxu1 }
 0x255   :  { %v746_v8 = vadd.f32 %v2343_v7, %v2977_v52  ;;  %v737_v9 = vpop.f32.mrb[5].mxu1 }
 0x256   :  { %v738_v10 = vadd.f32 %v2977_v52, %v737_v9  ;;  %v2344_v12 = vpop.f32.mrb[6].mxu1 }
 0x257   :  { %v749_v13 = vadd.f32 %v2344_v12, %v2977_v52  ;;  %v740_v14 = vpop.f32.mrb[7].mxu1  ;;  %v854_v16 = vmax.f32 %v746_v8, 0.0 }
 0x258   :  { %v741_v15 = vadd.f32 %v2977_v52, %v740_v14  ;;  %v852_v18 = vmax.f32 %v738_v10, 0.0 }
 0x259   :  { %v855_v17 = vmax.f32 %v749_v13, 0.0 }
 0x25a   :  { %v853_v19 = vmax.f32 %v741_v15, 0.0 }
 0x25b   :  { %v883_v20 = vpack.c.bf16 %v855_v17, %v854_v16  ;;  %v2610_v16 = vld [vmem:[#allocation10 + $0x30] sm:$0xff]  }
 0x25c   :  { %v882_v21 = vpack.c.bf16 %v853_v19, %v852_v18  ;;  %2429 = vmatprep.subr.bf16.mxu0 %v2610_v16 }
 0x25d   :  { %2430 = vmatpush3.bf16.msra.mxu0 %v2610_v16 }
 0x25e   :  { %2389 = vmatprep.mubr.bf16.mxu1 %v882_v21 }
 0x25f   :  { %2390 = vmatmul.mubr.bf16.gmra.mrb[36].mxu1 %v883_v20 }
 0x264   :  { %v2347_v22 = vpop.f32.mrb[8].mxu1 }
 0x265   :  { %v762_v23 = vadd.f32 %v2347_v22, %v2977_v52  ;;  %v753_v24 = vpop.f32.mrb[9].mxu1 }
 0x266   :  { %v754_v25 = vadd.f32 %v2977_v52, %v753_v24  ;;  %v2348_v26 = vpop.f32.mrb[10].mxu1  ;;  %v2611_v24 = vld [vmem:[#allocation10 + $0x38] sm:$0xff]  }
 0x267   :  { %v765_v27 = vadd.f32 %v2348_v26, %v2977_v52  ;;  %v756_v28 = vpop.f32.mrb[11].mxu1  ;;  %v858_v30 = vmax.f32 %v762_v23, 0.0  ;;  %2431 = vmatprep.subr.bf16.mxu0 %v2611_v24 }
 0x268   :  { %v757_v29 = vadd.f32 %v2977_v52, %v756_v28  ;;  %v856_v32 = vmax.f32 %v754_v25, 0.0  ;;  %2432 = vmatpush3.bf16.msra.mxu0 %v2611_v24 }
 0x269   :  { %v859_v31 = vmax.f32 %v765_v27, 0.0 }
 0x26a   :  { %v857_v33 = vmax.f32 %v757_v29, 0.0 }
 0x26b   :  { %v885_v34 = vpack.c.bf16 %v859_v31, %v858_v30 }
 0x26c   :  { %v884_v35 = vpack.c.bf16 %v857_v33, %v856_v32 }
 0x26e   :  { %2393 = vmatprep.mubr.bf16.mxu1 %v884_v35 }
 0x26f   :  { %2394 = vmatmul.mubr.bf16.gmra.mrb[40].mxu1 %v885_v34 }
 0x274   :  { %v2351_v36 = vpop.f32.mrb[12].mxu1 }
 0x275   :  { %v778_v37 = vadd.f32 %v2351_v36, %v2977_v52  ;;  %v769_v38 = vpop.f32.mrb[13].mxu1 }
 0x276   :  { %v770_v39 = vadd.f32 %v2977_v52, %v769_v38  ;;  %v2352_v40 = vpop.f32.mrb[14].mxu1 }
 0x277   :  { %v781_v41 = vadd.f32 %v2352_v40, %v2977_v52  ;;  %v772_v42 = vpop.f32.mrb[15].mxu1  ;;  %v862_v44 = vmax.f32 %v778_v37, 0.0 }
 0x278   :  { %v773_v43 = vadd.f32 %v2977_v52, %v772_v42  ;;  %v860_v46 = vmax.f32 %v770_v39, 0.0 }
 0x279   :  { %v863_v45 = vmax.f32 %v781_v41, 0.0 }
 0x27a   :  { %v861_v47 = vmax.f32 %v773_v43, 0.0 }
 0x27b   :  { %v887_v48 = vpack.c.bf16 %v863_v45, %v862_v44 }
 0x27c   :  { %v886_v49 = vpack.c.bf16 %v861_v47, %v860_v46  ;;  %v3015_v46 = vld [vmem:[%s3143_s5] ss:$0 sm:$0xff] }
 0x27e   :  { %2397 = vmatprep.mubr.bf16.mxu1 %v886_v49 }
 0x27f   :  { %2398 = vmatmul.mubr.bf16.gmra.mrb[44].mxu1 %v887_v48 }
 0x284   :  { %v2355_v50 = vpop.f32.mrb[16].mxu1 }
 0x285   :  { %v794_v51 = vadd.f32 %v2355_v50, %v2977_v52  ;;  %v785_v53 = vpop.f32.mrb[17].mxu1 }
 0x286   :  { %v786_v54 = vadd.f32 %v2977_v52, %v785_v53  ;;  %v2356_v55 = vpop.f32.mrb[18].mxu1 }
 0x287   :  { %v797_v56 = vadd.f32 %v2356_v55, %v2977_v52  ;;  %v788_v57 = vpop.f32.mrb[19].mxu1  ;;  %v866_v59 = vmax.f32 %v794_v51, 0.0 }
 0x288   :  { %v789_v58 = vadd.f32 %v2977_v52, %v788_v57  ;;  %v864_v61 = vmax.f32 %v786_v54, 0.0 }
 0x289   :  { %v867_v60 = vmax.f32 %v797_v56, 0.0 }
 0x28a   :  { %v865_v62 = vmax.f32 %v789_v58, 0.0 }
 0x28b   :  { %v889_v63 = vpack.c.bf16 %v867_v60, %v866_v59 }
 0x28c   :  { %v888_v0 = vpack.c.bf16 %v865_v62, %v864_v61 }
 0x28e   :  { %2401 = vmatprep.mubr.bf16.mxu1 %v888_v0 }
 0x28f   :  { %2402 = vmatmul.mubr.bf16.gmra.mrb[48].mxu1 %v889_v63 }
 0x294   :  { %v2359_v1 = vpop.f32.mrb[20].mxu1 }
 0x295   :  { %v810_v2 = vadd.f32 %v2359_v1, %v2977_v52  ;;  %v801_v3 = vpop.f32.mrb[21].mxu1 }
 0x296   :  { %v802_v4 = vadd.f32 %v2977_v52, %v801_v3  ;;  %v2360_v5 = vpop.f32.mrb[22].mxu1 }
 0x297   :  { %v813_v6 = vadd.f32 %v2360_v5, %v2977_v52  ;;  %v804_v7 = vpop.f32.mrb[23].mxu1  ;;  %v870_v9 = vmax.f32 %v810_v2, 0.0 }
 0x298   :  { %v805_v8 = vadd.f32 %v2977_v52, %v804_v7  ;;  %v868_v12 = vmax.f32 %v802_v4, 0.0 }
 0x299   :  { %v871_v10 = vmax.f32 %v813_v6, 0.0 }
 0x29a   :  { %v869_v13 = vmax.f32 %v805_v8, 0.0 }
 0x29b   :  { %v891_v14 = vpack.c.bf16 %v871_v10, %v870_v9 }
 0x29c   :  { %v890_v15 = vpack.c.bf16 %v869_v13, %v868_v12 }
 0x29e   :  { %2405 = vmatprep.mubr.bf16.mxu1 %v890_v15 }
 0x29f   :  { %2406 = vmatmul.mubr.bf16.gmra.mrb[52].mxu1 %v891_v14 }
 0x2a4   :  { %v2363_v17 = vpop.f32.mrb[24].mxu1 }
 0x2a5   :  { %v826_v18 = vadd.f32 %v2363_v17, %v2977_v52  ;;  %v817_v19 = vpop.f32.mrb[25].mxu1 }
 0x2a6   :  { %v818_v20 = vadd.f32 %v2977_v52, %v817_v19  ;;  %v2364_v21 = vpop.f32.mrb[26].mxu1 }
 0x2a7   :  { %v829_v22 = vadd.f32 %v2364_v21, %v2977_v52  ;;  %v820_v23 = vpop.f32.mrb[27].mxu1  ;;  %v874_v26 = vmax.f32 %v826_v18, 0.0 }
 0x2a8   :  { %v821_v25 = vadd.f32 %v2977_v52, %v820_v23  ;;  %v872_v28 = vmax.f32 %v818_v20, 0.0 }
 0x2a9   :  { %v875_v27 = vmax.f32 %v829_v22, 0.0 }
 0x2aa   :  { %v873_v29 = vmax.f32 %v821_v25, 0.0 }
 0x2ab   :  { %v893_v30 = vpack.c.bf16 %v875_v27, %v874_v26 }
 0x2ac   :  { %v892_v31 = vpack.c.bf16 %v873_v29, %v872_v28 }
 0x2ae   :  { %2409 = vmatprep.mubr.bf16.mxu1 %v892_v31 }
 0x2af   :  { %2410 = vmatmul.mubr.bf16.gmra.mrb[56].mxu1 %v893_v30 }
 0x2b4   :  { %v2367_v32 = vpop.f32.mrb[28].mxu1 }
 0x2b5   :  { %v842_v33 = vadd.f32 %v2367_v32, %v2977_v52  ;;  %v833_v34 = vpop.f32.mrb[29].mxu1 }
 0x2b6   :  { %v834_v35 = vadd.f32 %v2977_v52, %v833_v34  ;;  %v2368_v36 = vpop.f32.mrb[30].mxu1 }
 0x2b7   :  { %v845_v37 = vadd.f32 %v2368_v36, %v2977_v52  ;;  %v836_v38 = vpop.f32.mrb[31].mxu1  ;;  %v878_v40 = vmax.f32 %v842_v33, 0.0 }
 0x2b8   :  { %v837_v39 = vadd.f32 %v2977_v52, %v836_v38  ;;  %v876_v42 = vmax.f32 %v834_v35, 0.0 }
 0x2b9   :  { %v879_v41 = vmax.f32 %v845_v37, 0.0 }
 0x2ba   :  { %v877_v43 = vmax.f32 %v837_v39, 0.0 }
 0x2bb   :  { %v895_v44 = vpack.c.bf16 %v879_v41, %v878_v40 }
 0x2bc   :  { %v894_v45 = vpack.c.bf16 %v877_v43, %v876_v42 }
 0x2be   :  { %2413 = vmatprep.mubr.bf16.mxu1 %v894_v45 }
 0x2bf   :  { %2414 = vmatmul.mubr.bf16.gmra.mrb[60].mxu1 %v895_v44 }
 0x2c0   :  { %1456 = vmatprep.mubr.bf16.mxu1 %v2971_v11 }
 0x322   :  { %v2387_v47 = vpop.f32.mrb[32].mxu1 }
 0x323   :  { %v1010_v48 = vadd.f32 %v2387_v47, %v3015_v46  ;;  %v1001_v49 = vpop.f32.mrb[33].mxu1 }
 0x324   :  { %v1002_v52 = vadd.f32 %v3015_v46, %v1001_v49  ;;  %v2388_v50 = vpop.f32.mrb[34].mxu1 }
 0x325   :  { %v1013_v51 = vadd.f32 %v2388_v50, %v3015_v46  ;;  %v1004_v53 = vpop.f32.mrb[35].mxu1  ;;  %v1130_v55 = vmax.f32 %v1010_v48, 0.0 }
 0x326   :  { %v1005_v54 = vadd.f32 %v3015_v46, %v1004_v53  ;;  %v1128_v11 = vmax.f32 %v1002_v52, 0.0 }
 0x327   :  { %v1131_v56 = vmax.f32 %v1013_v51, 0.0 }
 0x328   :  { %v1129_v57 = vmax.f32 %v1005_v54, 0.0 }
 0x329   :  { %v1161_v58 = vpack.c.bf16 %v1131_v56, %v1130_v55 }
 0x32a   :  { %v1160_v59 = vpack.c.bf16 %v1129_v57, %v1128_v11 }
 0x32c   :  { %2433 = vmatprep.mubr.bf16.mxu0 %v1160_v59 }
 0x32d   :  { %2434 = vmatmul.mubr.bf16.vlgmr.msra.gmra.mrb[64].mxu0 %v1161_v58 }
 0x332   :  { %v2391_v60 = vpop.f32.mrb[36].mxu1 }
 0x333   :  { %v1026_v61 = vadd.f32 %v2391_v60, %v3015_v46  ;;  %v1017_v62 = vpop.f32.mrb[37].mxu1 }
 0x334   :  { %v1018_v63 = vadd.f32 %v3015_v46, %v1017_v62  ;;  %v2392_v0 = vpop.f32.mrb[38].mxu1 }
 0x335   :  { %v1029_v1 = vadd.f32 %v2392_v0, %v3015_v46  ;;  %v1020_v2 = vpop.f32.mrb[39].mxu1  ;;  %v1134_v4 = vmax.f32 %v1026_v61, 0.0 }
 0x336   :  { %v1021_v3 = vadd.f32 %v3015_v46, %v1020_v2  ;;  %v1132_v6 = vmax.f32 %v1018_v63, 0.0 }
 0x337   :  { %v1135_v5 = vmax.f32 %v1029_v1, 0.0 }
 0x338   :  { %v1133_v7 = vmax.f32 %v1021_v3, 0.0 }
 0x339   :  { %v1163_v8 = vpack.c.bf16 %v1135_v5, %v1134_v4 }
 0x33a   :  { %v1162_v9 = vpack.c.bf16 %v1133_v7, %v1132_v6 }
 0x33c   :  { %2437 = vmatprep.mubr.bf16.mxu0 %v1162_v9 }
 0x33d   :  { %2438 = vmatmul.mubr.bf16.gmra.mrb[68].mxu0 %v1163_v8 }
 0x342   :  { %v2395_v10 = vpop.f32.mrb[40].mxu1 }
 0x343   :  { %v1042_v12 = vadd.f32 %v2395_v10, %v3015_v46  ;;  %v1033_v13 = vpop.f32.mrb[41].mxu1 }
 0x344   :  { %v1034_v14 = vadd.f32 %v3015_v46, %v1033_v13  ;;  %v2396_v15 = vpop.f32.mrb[42].mxu1 }
 0x345   :  { %v1045_v16 = vadd.f32 %v2396_v15, %v3015_v46  ;;  %v1036_v17 = vpop.f32.mrb[43].mxu1  ;;  %v1138_v19 = vmax.f32 %v1042_v12, 0.0 }
 0x346   :  { %v1037_v18 = vadd.f32 %v3015_v46, %v1036_v17  ;;  %v1136_v21 = vmax.f32 %v1034_v14, 0.0 }
 0x347   :  { %v1139_v20 = vmax.f32 %v1045_v16, 0.0 }
 0x348   :  { %v1137_v22 = vmax.f32 %v1037_v18, 0.0 }
 0x349   :  { %v1165_v23 = vpack.c.bf16 %v1139_v20, %v1138_v19 }
 0x34a   :  { %v1164_v24 = vpack.c.bf16 %v1137_v22, %v1136_v21 }
 0x34c   :  { %2441 = vmatprep.mubr.bf16.mxu0 %v1164_v24 }
 0x34d   :  { %2442 = vmatmul.mubr.bf16.gmra.mrb[72].mxu0 %v1165_v23 }
 0x352   :  { %v2399_v25 = vpop.f32.mrb[44].mxu1 }
 0x353   :  { %v1058_v26 = vadd.f32 %v2399_v25, %v3015_v46  ;;  %v1049_v27 = vpop.f32.mrb[45].mxu1 }
 0x354   :  { %v1050_v28 = vadd.f32 %v3015_v46, %v1049_v27  ;;  %v2400_v29 = vpop.f32.mrb[46].mxu1 }
 0x355   :  { %v1061_v30 = vadd.f32 %v2400_v29, %v3015_v46  ;;  %v1052_v31 = vpop.f32.mrb[47].mxu1  ;;  %v1142_v33 = vmax.f32 %v1058_v26, 0.0 }
 0x356   :  { %v1053_v32 = vadd.f32 %v3015_v46, %v1052_v31  ;;  %v1140_v35 = vmax.f32 %v1050_v28, 0.0 }
 0x357   :  { %v1143_v34 = vmax.f32 %v1061_v30, 0.0 }
 0x358   :  { %v1141_v36 = vmax.f32 %v1053_v32, 0.0 }
 0x359   :  { %v1167_v37 = vpack.c.bf16 %v1143_v34, %v1142_v33 }
 0x35a   :  { %v1166_v38 = vpack.c.bf16 %v1141_v36, %v1140_v35 }
 0x35c   :  { %2445 = vmatprep.mubr.bf16.mxu0 %v1166_v38 }
 0x35d   :  { %2446 = vmatmul.mubr.bf16.gmra.mrb[76].mxu0 %v1167_v37 }
 0x362   :  { %v2403_v39 = vpop.f32.mrb[48].mxu1 }
 0x363   :  { %v1074_v40 = vadd.f32 %v2403_v39, %v3015_v46  ;;  %v1065_v41 = vpop.f32.mrb[49].mxu1 }
 0x364   :  { %v1066_v42 = vadd.f32 %v3015_v46, %v1065_v41  ;;  %v2404_v43 = vpop.f32.mrb[50].mxu1 }
 0x365   :  { %v1077_v44 = vadd.f32 %v2404_v43, %v3015_v46  ;;  %v1068_v45 = vpop.f32.mrb[51].mxu1  ;;  %v1146_v48 = vmax.f32 %v1074_v40, 0.0 }
 0x366   :  { %v1069_v47 = vadd.f32 %v3015_v46, %v1068_v45  ;;  %v1144_v52 = vmax.f32 %v1066_v42, 0.0 }
 0x367   :  { %v1147_v49 = vmax.f32 %v1077_v44, 0.0 }
 0x368   :  { %v1145_v50 = vmax.f32 %v1069_v47, 0.0 }
 0x369   :  { %v1169_v51 = vpack.c.bf16 %v1147_v49, %v1146_v48 }
 0x36a   :  { %v1168_v53 = vpack.c.bf16 %v1145_v50, %v1144_v52 }
 0x36c   :  { %2449 = vmatprep.mubr.bf16.mxu0 %v1168_v53 }
 0x36d   :  { %2450 = vmatmul.mubr.bf16.gmra.mrb[80].mxu0 %v1169_v51 }
 0x372   :  { %v2407_v54 = vpop.f32.mrb[52].mxu1 }
 0x373   :  { %v1090_v55 = vadd.f32 %v2407_v54, %v3015_v46  ;;  %v1081_v56 = vpop.f32.mrb[53].mxu1 }
 0x374   :  { %v1082_v11 = vadd.f32 %v3015_v46, %v1081_v56  ;;  %v2408_v57 = vpop.f32.mrb[54].mxu1 }
 0x375   :  { %v1093_v58 = vadd.f32 %v2408_v57, %v3015_v46  ;;  %v1084_v59 = vpop.f32.mrb[55].mxu1  ;;  %v1150_v61 = vmax.f32 %v1090_v55, 0.0 }
 0x376   :  { %v1085_v60 = vadd.f32 %v3015_v46, %v1084_v59  ;;  %v1148_v63 = vmax.f32 %v1082_v11, 0.0 }
 0x377   :  { %v1151_v62 = vmax.f32 %v1093_v58, 0.0 }
 0x378   :  { %v1149_v0 = vmax.f32 %v1085_v60, 0.0 }
 0x379   :  { %v1171_v1 = vpack.c.bf16 %v1151_v62, %v1150_v61 }
 0x37a   :  { %v1170_v2 = vpack.c.bf16 %v1149_v0, %v1148_v63 }
 0x37c   :  { %2453 = vmatprep.mubr.bf16.mxu0 %v1170_v2 }
 0x37d   :  { %2454 = vmatmul.mubr.bf16.gmra.mrb[84].mxu0 %v1171_v1 }
 0x382   :  { %v2411_v3 = vpop.f32.mrb[56].mxu1 }
 0x383   :  { %v1106_v4 = vadd.f32 %v2411_v3, %v3015_v46  ;;  %v1097_v5 = vpop.f32.mrb[57].mxu1 }
 0x384   :  { %v1098_v6 = vadd.f32 %v3015_v46, %v1097_v5  ;;  %v2412_v7 = vpop.f32.mrb[58].mxu1 }
 0x385   :  { %v1109_v8 = vadd.f32 %v2412_v7, %v3015_v46  ;;  %v1100_v9 = vpop.f32.mrb[59].mxu1  ;;  %v1154_v12 = vmax.f32 %v1106_v4, 0.0 }
 0x386   :  { %v1101_v10 = vadd.f32 %v3015_v46, %v1100_v9  ;;  %v1152_v14 = vmax.f32 %v1098_v6, 0.0 }
 0x387   :  { %v1155_v13 = vmax.f32 %v1109_v8, 0.0 }
 0x388   :  { %v1153_v15 = vmax.f32 %v1101_v10, 0.0 }
 0x389   :  { %v1173_v16 = vpack.c.bf16 %v1155_v13, %v1154_v12 }
 0x38a   :  { %v1172_v17 = vpack.c.bf16 %v1153_v15, %v1152_v14 }
 0x38c   :  { %2457 = vmatprep.mubr.bf16.mxu0 %v1172_v17  ;;  %v2613_v17 = vld [vmem:[#allocation11 + $0x8] sm:$0xff]  }
 0x38d   :  { %2458 = vmatmul.mubr.bf16.gmra.mrb[88].mxu0 %v1173_v16  ;;  %v2612_v16 = vld [vmem:[#allocation11] sm:$0xff]  }
 0x38e   :  { %2465 = vmatprep.subr.bf16.mxu0 %v2612_v16 }
 0x38f   :  { %2466 = vmatpush3.bf16.msra.mxu0 %v2612_v16 }
 0x390   :  { %2467 = vmatprep.subr.bf16.mxu0 %v2613_v17 }
 0x392   :  { %v2415_v18 = vpop.f32.mrb[60].mxu1 }
 0x393   :  { %v1122_v19 = vadd.f32 %v2415_v18, %v3015_v46  ;;  %v1113_v20 = vpop.f32.mrb[61].mxu1  ;;  %v2614_v18 = vld [vmem:[#allocation11 + $0x10] sm:$0xff]   ;;  %2468 = vmatpush3.bf16.msra.mxu0 %v2613_v17 }
 0x394   :  { %v1114_v21 = vadd.f32 %v3015_v46, %v1113_v20  ;;  %v2416_v22 = vpop.f32.mrb[62].mxu1  ;;  %2469 = vmatprep.subr.bf16.mxu0 %v2614_v18  ;;  %v2615_v20 = vld [vmem:[#allocation11 + $0x18] sm:$0xff]  }
 0x395   :  { %v1125_v23 = vadd.f32 %v2416_v22, %v3015_v46  ;;  %v1116_v24 = vpop.f32.mrb[63].mxu1  ;;  %v1158_v26 = vmax.f32 %v1122_v19, 0.0  ;;  %v2620_v19 = vld [vmem:[#allocation2] ss:$8 sps:$4 sm:$0xff]   ;;  %v2622_v22 = vld [vmem:[#allocation2 + $0x10] ss:$8 sps:$4 sm:$0xff]  }
 0x396   :  { %v1117_v25 = vadd.f32 %v3015_v46, %v1116_v24  ;;  %v1156_v28 = vmax.f32 %v1114_v21, 0.0  ;;  %v2621_v21 = vld [vmem:[#allocation2 + $0x14] ss:$8 sps:$4 sm:$0xff]   ;;  %v2624_v24 = vld [vmem:[#allocation2 + $0x20] ss:$8 sps:$4 sm:$0xff]  }
 0x397   :  { %v1159_v27 = vmax.f32 %v1125_v23, 0.0  ;;  %2470 = vmatpush3.bf16.msra.mxu0 %v2614_v18  ;;  %v2623_v23 = vld [vmem:[#allocation2 + $0x24] ss:$8 sps:$4 sm:$0xff]  }
 0x398   :  { %v1157_v29 = vmax.f32 %v1117_v25, 0.0  ;;  %2471 = vmatprep.subr.bf16.mxu0 %v2615_v20  ;;  %v2625_v25 = vld [vmem:[#allocation2 + $0x34] ss:$8 sps:$4 sm:$0xff]  }
 0x399   :  { %v1175_v30 = vpack.c.bf16 %v1159_v27, %v1158_v26  ;;  %v2626_v26 = vld [vmem:[#allocation2 + $0x30] ss:$8 sps:$4 sm:$0xff]   ;;  %v2627_v27 = vld [vmem:[#allocation2 + $0x44] ss:$8 sps:$4 sm:$0xff]  }
 0x39a   :  { %v1174_v31 = vpack.c.bf16 %v1157_v29, %v1156_v28  ;;  %v2628_v28 = vld [vmem:[#allocation2 + $0x40] ss:$8 sps:$4 sm:$0xff]   ;;  %v2629_v29 = vld [vmem:[#allocation2 + $0x54] ss:$8 sps:$4 sm:$0xff]  }
 0x39b   :  { %2472 = vmatpush3.bf16.msra.mxu0 %v2615_v20 }
 0x39c   :  { %2461 = vmatprep.mubr.bf16.mxu0 %v1174_v31  ;;  %v2631_v31 = vld [vmem:[#allocation2 + $0x64] ss:$8 sps:$4 sm:$0xff]  }
 0x39d   :  { %2462 = vmatmul.mubr.bf16.gmra.mrb[92].mxu0 %v1175_v30  ;;  %v2630_v30 = vld [vmem:[#allocation2 + $0x50] ss:$8 sps:$4 sm:$0xff]  }
 0x400   :  { %v2435_v32 = vpop.f32.mrb[64].mxu0 }
 0x401   :  { %v1274_v33 = vpop.f32.mrb[65].mxu0 }
 0x402   :  { %v2436_v34 = vpop.f32.mrb[66].mxu0 }
 0x403   :  { %v1402_v35 = vpack.c.bf16 %v2436_v34, %v2435_v32  ;;  %v1277_v36 = vpop.f32.mrb[67].mxu0  ;;  %v2632_v32 = vld [vmem:[#allocation2 + $0x60] ss:$8 sps:$4 sm:$0xff]   ;;  %v2634_v34 = vld [vmem:[#allocation2 + $0x70] ss:$8 sps:$4 sm:$0xff]  }
 0x404   :  { %v1401_v37 = vpack.c.bf16 %v1277_v36, %v1274_v33  ;;  %v2633_v33 = vld [vmem:[#allocation2 + $0x74] ss:$8 sps:$4 sm:$0xff]   ;;  %v2636_v36 = vld [vmem:[#allocation2 + $0x80] ss:$8 sps:$4 sm:$0xff]  }
 0x410   :  { %v2439_v38 = vpop.f32.mrb[68].mxu0 }
 0x411   :  { %v1290_v39 = vpop.f32.mrb[69].mxu0 }
 0x412   :  { %v2440_v40 = vpop.f32.mrb[70].mxu0 }
 0x413   :  { %v1404_v41 = vpack.c.bf16 %v2440_v40, %v2439_v38  ;;  %v1293_v42 = vpop.f32.mrb[71].mxu0  ;;  %v2638_v38 = vld [vmem:[#allocation2 + $0x90] ss:$8 sps:$4 sm:$0xff]   ;;  %v2640_v40 = vld [vmem:[#allocation2 + $0xa0] ss:$8 sps:$4 sm:$0xff]  }
 0x414   :  { %v1403_v46 = vpack.c.bf16 %v1293_v42, %v1290_v39  ;;  %v2639_v39 = vld [vmem:[#allocation2 + $0xa4] ss:$8 sps:$4 sm:$0xff]  }
 0x415   :  { %v2616_v42 = vld [vmem:[#allocation11 + $0x20] sm:$0xff]  }
 0x416   :  { %2473 = vmatprep.subr.bf16.mxu0 %v2616_v42 }
 0x417   :  { %2474 = vmatpush3.bf16.msra.mxu0 %v2616_v42 }
 0x420   :  { %v2443_v43 = vpop.f32.mrb[72].mxu0 }
 0x421   :  { %v1306_v44 = vpop.f32.mrb[73].mxu0 }
 0x422   :  { %v2444_v45 = vpop.f32.mrb[74].mxu0 }
 0x423   :  { %v1406_v47 = vpack.c.bf16 %v2444_v45, %v2443_v43  ;;  %v1309_v48 = vpop.f32.mrb[75].mxu0  ;;  %v2643_v43 = vld [vmem:[#allocation2 + $0xc4] ss:$8 sps:$4 sm:$0xff]   ;;  %v2618_v45 = vld [vmem:[#allocation11 + $0x30] sm:$0xff]  }
 0x424   :  { %v1405_v49 = vpack.c.bf16 %v1309_v48, %v1306_v44  ;;  %v2617_v44 = vld [vmem:[#allocation11 + $0x28] sm:$0xff]   ;;  %v2645_v48 = vld [vmem:[#allocation2 + $0xd4] ss:$8 sps:$4 sm:$0xff]  }
 0x425   :  { %2475 = vmatprep.subr.bf16.mxu0 %v2617_v44 }
 0x426   :  { %2476 = vmatpush3.bf16.msra.mxu0 %v2617_v44 }
 0x427   :  { %2477 = vmatprep.subr.bf16.mxu0 %v2618_v45 }
 0x42a   :  { %2478 = vmatpush3.bf16.msra.mxu0 %v2618_v45 }
 0x430   :  { %v2447_v52 = vpop.f32.mrb[76].mxu0 }
 0x431   :  { %v1322_v50 = vpop.f32.mrb[77].mxu0 }
 0x432   :  { %v2448_v51 = vpop.f32.mrb[78].mxu0 }
 0x433   :  { %v1408_v53 = vpack.c.bf16 %v2448_v51, %v2447_v52  ;;  %v1325_v54 = vpop.f32.mrb[79].mxu0  ;;  %v2646_v52 = vld [vmem:[#allocation2 + $0xd0] ss:$8 sps:$4 sm:$0xff]   ;;  %v2648_v51 = vld [vmem:[#allocation2 + $0xe0] ss:$8 sps:$4 sm:$0xff]  }
 0x434   :  { %v1407_v55 = vpack.c.bf16 %v1325_v54, %v1322_v50  ;;  %v2647_v50 = vld [vmem:[#allocation2 + $0xe4] ss:$8 sps:$4 sm:$0xff]   ;;  %v2650_v54 = vld [vmem:[#allocation2 + $0xf0] ss:$8 sps:$4 sm:$0xff]  }
 0x440   :  { %v2451_v56 = vpop.f32.mrb[80].mxu0 }
 0x441   :  { %v1338_v11 = vpop.f32.mrb[81].mxu0 }
 0x442   :  { %v2452_v57 = vpop.f32.mrb[82].mxu0 }
 0x443   :  { %v1410_v58 = vpack.c.bf16 %v2452_v57, %v2451_v56  ;;  %v1341_v59 = vpop.f32.mrb[83].mxu0  ;;  %v3052_v56 = vld [vmem:[%s3145_s7] ss:$0 sm:$0xff] }
 0x444   :  { %v1409_v60 = vpack.c.bf16 %v1341_v59, %v1338_v11 }
 0x446   :  { %2185 = vmatprep.subr.bf16.mxu1 %v1409_v60 }
 0x447   :  { %2186 = vmatpush3.bf16.msra.mxu1 %v1401_v37  ;;  %v2637_v37 = vld [vmem:[#allocation2 + $0x94] ss:$8 sps:$4 sm:$0xff]  }
 0x448   :  { %2187 = vmatprep.subr.bf16.mxu1 %v1410_v58 }
 0x44b   :  { %2188 = vmatpush3.bf16.msra.mxu1 %v1402_v35  ;;  %v2635_v35 = vld [vmem:[#allocation2 + $0x84] ss:$8 sps:$4 sm:$0xff]  }
 0x450   :  { %v2455_v61 = vpop.f32.mrb[84].mxu0 }
 0x451   :  { %v1354_v62 = vpop.f32.mrb[85].mxu0 }
 0x452   :  { %v2456_v63 = vpop.f32.mrb[86].mxu0 }
 0x453   :  { %v1412_v0 = vpack.c.bf16 %v2456_v63, %v2455_v61  ;;  %v1357_v1 = vpop.f32.mrb[87].mxu0 }
 0x454   :  { %v1411_v2 = vpack.c.bf16 %v1357_v1, %v1354_v62 }
 0x456   :  { %2189 = vmatprep.subr.bf16.mxu1 %v1411_v2 }
 0x457   :  { %2190 = vmatpush3.bf16.msra.mxu1 %v1403_v46  ;;  %v2642_v46 = vld [vmem:[#allocation2 + $0xb0] ss:$8 sps:$4 sm:$0xff]  }
 0x458   :  { %2191 = vmatprep.subr.bf16.mxu1 %v1412_v0 }
 0x45b   :  { %2192 = vmatpush3.bf16.msra.mxu1 %v1404_v41  ;;  %v2641_v41 = vld [vmem:[#allocation2 + $0xb4] ss:$8 sps:$4 sm:$0xff]  }
 0x460   :  { %v2459_v3 = vpop.f32.mrb[88].mxu0 }
 0x461   :  { %v1370_v4 = vpop.f32.mrb[89].mxu0 }
 0x462   :  { %v2460_v5 = vpop.f32.mrb[90].mxu0 }
 0x463   :  { %v1414_v6 = vpack.c.bf16 %v2460_v5, %v2459_v3  ;;  %v1373_v7 = vpop.f32.mrb[91].mxu0 }
 0x464   :  { %v1413_v8 = vpack.c.bf16 %v1373_v7, %v1370_v4 }
 0x466   :  { %2193 = vmatprep.subr.bf16.mxu1 %v1413_v8 }
 0x467   :  { %2194 = vmatpush3.bf16.msra.mxu1 %v1405_v49  ;;  %v2619_v49 = vld [vmem:[#allocation11 + $0x38] sm:$0xff]  }
 0x468   :  { %2195 = vmatprep.subr.bf16.mxu1 %v1414_v6  ;;  %2479 = vmatprep.subr.bf16.mxu0 %v2619_v49 }
 0x469   :  { %2480 = vmatpush3.bf16.msra.mxu0 %v2619_v49 }
 0x46b   :  { %2196 = vmatpush3.bf16.msra.mxu1 %v1406_v47  ;;  %v2644_v47 = vld [vmem:[#allocation2 + $0xc0] ss:$8 sps:$4 sm:$0xff]  }
 0x470   :  { %v2463_v9 = vpop.f32.mrb[92].mxu0 }
 0x471   :  { %v1386_v10 = vpop.f32.mrb[93].mxu0 }
 0x472   :  { %v2464_v12 = vpop.f32.mrb[94].mxu0 }
 0x473   :  { %v1416_v13 = vpack.c.bf16 %v2464_v12, %v2463_v9  ;;  %v1389_v14 = vpop.f32.mrb[95].mxu0 }
 0x474   :  { %v1415_v15 = vpack.c.bf16 %v1389_v14, %v1386_v10 }
 0x476   :  { %2197 = vmatprep.subr.bf16.mxu1 %v1415_v15 }
 0x477   :  { %2198 = vmatpush3.bf16.msra.mxu1 %v1407_v55 }
 0x478   :  { %2199 = vmatprep.subr.bf16.mxu1 %v1416_v13 }
 0x47b   :  { %2200 = vmatpush3.bf16.msra.mxu1 %v1408_v53  ;;  %v2649_v53 = vld [vmem:[#allocation2 + $0xf4] ss:$8 sps:$4 sm:$0xff]  }
 0x47e   :  { %1457 = vmatmul.mubr.bf16.vlgmr.msra.gmra.mrb[64].mxu1 %v2620_v19 }
 0x47f   :  { %1464 = vmatprep.mubr.bf16.mxu1 %v2621_v21 }
 0x486   :  { %1465 = vmatmul.mubr.bf16.gmra.mrb[68].mxu1 %v2622_v22 }
 0x487   :  { %1472 = vmatprep.mubr.bf16.mxu1 %v2623_v23 }
 0x48e   :  { %1473 = vmatmul.mubr.bf16.gmra.mrb[72].mxu1 %v2624_v24 }
 0x48f   :  { %1480 = vmatprep.mubr.bf16.mxu1 %v2625_v25 }
 0x496   :  { %1481 = vmatmul.mubr.bf16.gmra.mrb[76].mxu1 %v2626_v26 }
 0x497   :  { %1488 = vmatprep.mubr.bf16.mxu1 %v2627_v27 }
 0x49e   :  { %1489 = vmatmul.mubr.bf16.gmra.mrb[80].mxu1 %v2628_v28 }
 0x49f   :  { %1496 = vmatprep.mubr.bf16.mxu1 %v2629_v29 }
 0x4a6   :  { %1497 = vmatmul.mubr.bf16.gmra.mrb[84].mxu1 %v2630_v30 }
 0x4a7   :  { %1504 = vmatprep.mubr.bf16.mxu1 %v2631_v31 }
 0x4ae   :  { %1505 = vmatmul.mubr.bf16.gmra.mrb[88].mxu1 %v2632_v32 }
 0x4af   :  { %1512 = vmatprep.mubr.bf16.mxu1 %v2633_v33 }
 0x4b6   :  { %1513 = vmatmul.mubr.bf16.gmra.mrb[92].mxu1 %v2634_v34 }
 0x4b7   :  { %1520 = vmatprep.mubr.bf16.mxu1 %v2635_v35 }
 0x4be   :  { %1521 = vmatmul.mubr.bf16.gmra.mrb[96].mxu1 %v2636_v36 }
 0x4bf   :  { %1528 = vmatprep.mubr.bf16.mxu1 %v2637_v37 }
 0x4c6   :  { %1529 = vmatmul.mubr.bf16.gmra.mrb[100].mxu1 %v2638_v38 }
 0x4c7   :  { %1536 = vmatprep.mubr.bf16.mxu1 %v2639_v39 }
 0x4ce   :  { %1537 = vmatmul.mubr.bf16.gmra.mrb[104].mxu1 %v2640_v40 }
 0x4cf   :  { %1544 = vmatprep.mubr.bf16.mxu1 %v2641_v41 }
 0x4d6   :  { %1545 = vmatmul.mubr.bf16.gmra.mrb[108].mxu1 %v2642_v46 }
 0x4d7   :  { %1552 = vmatprep.mubr.bf16.mxu1 %v2643_v43 }
 0x4de   :  { %1553 = vmatmul.mubr.bf16.gmra.mrb[112].mxu1 %v2644_v47 }
 0x4df   :  { %1560 = vmatprep.mubr.bf16.mxu1 %v2645_v48 }
 0x4e6   :  { %1561 = vmatmul.mubr.bf16.gmra.mrb[116].mxu1 %v2646_v52 }
 0x4e7   :  { %1568 = vmatprep.mubr.bf16.mxu1 %v2647_v50 }
 0x4ee   :  { %1569 = vmatmul.mubr.bf16.gmra.mrb[120].mxu1 %v2648_v51 }
 0x4ef   :  { %1576 = vmatprep.mubr.bf16.mxu1 %v2649_v53 }
 0x4f6   :  { %1577 = vmatmul.mubr.bf16.gmra.mrb[124].mxu1 %v2650_v54 }
 0x551   :  { %v2201_v55 = vpop.f32.mrb[64].mxu1 }
 0x552   :  { %v2202_v11 = vpop.f32.mrb[65].mxu1 }
 0x553   :  { %v2203_v57 = vadd.f32 %v2202_v11, %v2201_v55  ;;  %v2204_v58 = vpop.f32.mrb[66].mxu1 }
 0x554   :  { %v2205_v59 = vpop.f32.mrb[67].mxu1 }
 0x555   :  { %v1459_v60 = vadd.f32 %v2203_v57, %v3052_v56  ;;  %v2206_v61 = vadd.f32 %v2205_v59, %v2204_v58 }
 0x557   :  { %v1462_v62 = vadd.f32 %v2206_v61, %v3052_v56  ;;  %v1585_v63 = vmax.f32 %v1459_v60, 0.0 }
 0x559   :  { %v1586_v0 = vmax.f32 %v1462_v62, 0.0  ;;  %v2207_v1 = vpop.f32.mrb[68].mxu1 }
 0x55a   :  { %v2208_v2 = vpop.f32.mrb[69].mxu1 }
 0x55b   :  { %v2209_v3 = vadd.f32 %v2208_v2, %v2207_v1  ;;  %v2210_v4 = vpop.f32.mrb[70].mxu1  ;;  %v1617_v5 = vpack.c.bf16 %v1586_v0, %v1585_v63 }
 0x55c   :  { %v2211_v6 = vpop.f32.mrb[71].mxu1 }
 0x55d   :  { %v1467_v7 = vadd.f32 %v2209_v3, %v3052_v56  ;;  %v2212_v8 = vadd.f32 %v2211_v6, %v2210_v4  ;;  %2481 = vmatprep.mubr.bf16.mxu0 %v1617_v5 }
 0x55f   :  { %v1470_v9 = vadd.f32 %v2212_v8, %v3052_v56  ;;  %v1587_v10 = vmax.f32 %v1467_v7, 0.0 }
 0x561   :  { %v1588_v12 = vmax.f32 %v1470_v9, 0.0  ;;  %v2213_v13 = vpop.f32.mrb[72].mxu1 }
 0x562   :  { %v2214_v14 = vpop.f32.mrb[73].mxu1 }
 0x563   :  { %v1618_v15 = vpack.c.bf16 %v1588_v12, %v1587_v10  ;;  %v2215_v16 = vadd.f32 %v2214_v14, %v2213_v13  ;;  %v2216_v17 = vpop.f32.mrb[74].mxu1 }
 0x564   :  { %v2217_v18 = vpop.f32.mrb[75].mxu1 }
 0x565   :  { %v1475_v19 = vadd.f32 %v2215_v16, %v3052_v56  ;;  %2482 = vmatmul.mubr.bf16.vlgmr.msra.gmra.mrb[96].mxu0 %v1618_v15  ;;  %v2218_v20 = vadd.f32 %v2217_v18, %v2216_v17 }
 0x567   :  { %v1478_v21 = vadd.f32 %v2218_v20, %v3052_v56  ;;  %v1589_v22 = vmax.f32 %v1475_v19, 0.0 }
 0x569   :  { %v1590_v23 = vmax.f32 %v1478_v21, 0.0  ;;  %v2219_v24 = vpop.f32.mrb[76].mxu1 }
 0x56a   :  { %v2220_v25 = vpop.f32.mrb[77].mxu1 }
 0x56b   :  { %v2221_v26 = vadd.f32 %v2220_v25, %v2219_v24  ;;  %v2222_v27 = vpop.f32.mrb[78].mxu1  ;;  %v1619_v28 = vpack.c.bf16 %v1590_v23, %v1589_v22 }
 0x56c   :  { %v2223_v29 = vpop.f32.mrb[79].mxu1 }
 0x56d   :  { %v1483_v30 = vadd.f32 %v2221_v26, %v3052_v56  ;;  %v2224_v31 = vadd.f32 %v2223_v29, %v2222_v27  ;;  %2485 = vmatprep.mubr.bf16.mxu0 %v1619_v28 }
 0x56f   :  { %v1486_v32 = vadd.f32 %v2224_v31, %v3052_v56  ;;  %v1591_v33 = vmax.f32 %v1483_v30, 0.0 }
 0x571   :  { %v1592_v34 = vmax.f32 %v1486_v32, 0.0  ;;  %v2225_v35 = vpop.f32.mrb[80].mxu1 }
 0x572   :  { %v2226_v36 = vpop.f32.mrb[81].mxu1 }
 0x573   :  { %v2227_v37 = vadd.f32 %v2226_v36, %v2225_v35  ;;  %v1620_v38 = vpack.c.bf16 %v1592_v34, %v1591_v33  ;;  %v2228_v39 = vpop.f32.mrb[82].mxu1 }
 0x574   :  { %v2229_v40 = vpop.f32.mrb[83].mxu1 }
 0x575   :  { %v1491_v41 = vadd.f32 %v2227_v37, %v3052_v56  ;;  %2486 = vmatmul.mubr.bf16.gmra.mrb[100].mxu0 %v1620_v38  ;;  %v2230_v42 = vadd.f32 %v2229_v40, %v2228_v39 }
 0x577   :  { %v1494_v46 = vadd.f32 %v2230_v42, %v3052_v56  ;;  %v1593_v43 = vmax.f32 %v1491_v41, 0.0 }
 0x579   :  { %v1594_v44 = vmax.f32 %v1494_v46, 0.0  ;;  %v2231_v45 = vpop.f32.mrb[84].mxu1 }
 0x57a   :  { %v2232_v47 = vpop.f32.mrb[85].mxu1 }
 0x57b   :  { %v2233_v48 = vadd.f32 %v2232_v47, %v2231_v45  ;;  %v2234_v49 = vpop.f32.mrb[86].mxu1  ;;  %v1621_v52 = vpack.c.bf16 %v1594_v44, %v1593_v43 }
 0x57c   :  { %v2235_v50 = vpop.f32.mrb[87].mxu1 }
 0x57d   :  { %v1499_v51 = vadd.f32 %v2233_v48, %v3052_v56  ;;  %v2236_v53 = vadd.f32 %v2235_v50, %v2234_v49  ;;  %2489 = vmatprep.mubr.bf16.mxu0 %v1621_v52 }
 0x57f   :  { %v1502_v54 = vadd.f32 %v2236_v53, %v3052_v56  ;;  %v1595_v55 = vmax.f32 %v1499_v51, 0.0 }
 0x581   :  { %v1596_v11 = vmax.f32 %v1502_v54, 0.0  ;;  %v2237_v57 = vpop.f32.mrb[88].mxu1 }
 0x582   :  { %v2238_v58 = vpop.f32.mrb[89].mxu1 }
 0x583   :  { %v2239_v59 = vadd.f32 %v2238_v58, %v2237_v57  ;;  %v1622_v60 = vpack.c.bf16 %v1596_v11, %v1595_v55  ;;  %v2240_v61 = vpop.f32.mrb[90].mxu1 }
 0x584   :  { %v2241_v62 = vpop.f32.mrb[91].mxu1 }
 0x585   :  { %v1507_v63 = vadd.f32 %v2239_v59, %v3052_v56  ;;  %2490 = vmatmul.mubr.bf16.gmra.mrb[104].mxu0 %v1622_v60  ;;  %v2242_v0 = vadd.f32 %v2241_v62, %v2240_v61 }
 0x587   :  { %v1510_v1 = vadd.f32 %v2242_v0, %v3052_v56  ;;  %v1597_v2 = vmax.f32 %v1507_v63, 0.0 }
 0x589   :  { %v1598_v3 = vmax.f32 %v1510_v1, 0.0  ;;  %v2243_v4 = vpop.f32.mrb[92].mxu1 }
 0x58a   :  { %v2244_v5 = vpop.f32.mrb[93].mxu1 }
 0x58b   :  { %v2245_v6 = vadd.f32 %v2244_v5, %v2243_v4  ;;  %v2246_v7 = vpop.f32.mrb[94].mxu1  ;;  %v1623_v8 = vpack.c.bf16 %v1598_v3, %v1597_v2 }
 0x58c   :  { %v2247_v9 = vpop.f32.mrb[95].mxu1 }
 0x58d   :  { %v1515_v10 = vadd.f32 %v2245_v6, %v3052_v56  ;;  %v2248_v12 = vadd.f32 %v2247_v9, %v2246_v7  ;;  %2493 = vmatprep.mubr.bf16.mxu0 %v1623_v8 }
 0x58f   :  { %v1518_v13 = vadd.f32 %v2248_v12, %v3052_v56  ;;  %v1599_v14 = vmax.f32 %v1515_v10, 0.0 }
 0x591   :  { %v1600_v15 = vmax.f32 %v1518_v13, 0.0  ;;  %v2249_v16 = vpop.f32.mrb[96].mxu1 }
 0x592   :  { %v2250_v17 = vpop.f32.mrb[97].mxu1 }
 0x593   :  { %v2251_v18 = vadd.f32 %v2250_v17, %v2249_v16  ;;  %v1624_v19 = vpack.c.bf16 %v1600_v15, %v1599_v14  ;;  %v2252_v20 = vpop.f32.mrb[98].mxu1 }
 0x594   :  { %v2253_v21 = vpop.f32.mrb[99].mxu1 }
 0x595   :  { %v1523_v22 = vadd.f32 %v2251_v18, %v3052_v56  ;;  %2494 = vmatmul.mubr.bf16.gmra.mrb[108].mxu0 %v1624_v19  ;;  %v2254_v23 = vadd.f32 %v2253_v21, %v2252_v20 }
 0x597   :  { %v1526_v24 = vadd.f32 %v2254_v23, %v3052_v56  ;;  %v1601_v25 = vmax.f32 %v1523_v22, 0.0 }
 0x599   :  { %v1602_v26 = vmax.f32 %v1526_v24, 0.0  ;;  %v2255_v27 = vpop.f32.mrb[100].mxu1 }
 0x59a   :  { %v2256_v28 = vpop.f32.mrb[101].mxu1 }
 0x59b   :  { %v2257_v29 = vadd.f32 %v2256_v28, %v2255_v27  ;;  %v2258_v30 = vpop.f32.mrb[102].mxu1  ;;  %v1625_v31 = vpack.c.bf16 %v1602_v26, %v1601_v25 }
 0x59c   :  { %v2259_v32 = vpop.f32.mrb[103].mxu1 }
 0x59d   :  { %v1531_v33 = vadd.f32 %v2257_v29, %v3052_v56  ;;  %v2260_v34 = vadd.f32 %v2259_v32, %v2258_v30  ;;  %2497 = vmatprep.mubr.bf16.mxu0 %v1625_v31 }
 0x59f   :  { %v1534_v35 = vadd.f32 %v2260_v34, %v3052_v56  ;;  %v1603_v36 = vmax.f32 %v1531_v33, 0.0 }
 0x5a1   :  { %v1604_v37 = vmax.f32 %v1534_v35, 0.0  ;;  %v2261_v38 = vpop.f32.mrb[104].mxu1 }
 0x5a2   :  { %v2262_v39 = vpop.f32.mrb[105].mxu1 }
 0x5a3   :  { %v2263_v40 = vadd.f32 %v2262_v39, %v2261_v38  ;;  %v1626_v41 = vpack.c.bf16 %v1604_v37, %v1603_v36  ;;  %v2264_v42 = vpop.f32.mrb[106].mxu1 }
 0x5a4   :  { %v2265_v46 = vpop.f32.mrb[107].mxu1 }
 0x5a5   :  { %v1539_v43 = vadd.f32 %v2263_v40, %v3052_v56  ;;  %2498 = vmatmul.mubr.bf16.gmra.mrb[112].mxu0 %v1626_v41  ;;  %v2266_v44 = vadd.f32 %v2265_v46, %v2264_v42  ;;  %v3089_v42 = vld [vmem:[%s3147_s9] ss:$0 sm:$0xff]  ;;  %s2825_s9 = smov [#allocation13]  }
 0x5a6   :  { %s1902_s12 = sshll.u32 %s2825_s9, 4  ;;  %s1903_s12 = int_to_ptr.vmem [resolvable:$true] %s1902_s12 }
 0x5a7   :  { %v1542_v45 = vadd.f32 %v2266_v44, %v3052_v56  ;;  %v1605_v47 = vmax.f32 %v1539_v43, 0.0  ;;  %s2783_s13 = scalar_lea.vmem %s1903_s12, 4096  ;;  %p2788_p7 = scmp.lt.s32.totalorder %s1903_s12, %s1903_s12 }
 0x5a8   :  { %p2784_p6 = scmp.ne.s32.totalorder %s1903_s12, %s2783_s13  ;;  %p2789_p8 = scmp.lt.s32.totalorder %s2783_s13, %s2783_s13 }
 0x5a9   :  { %v1606_v48 = vmax.f32 %v1542_v45, 0.0  ;;  %v2267_v49 = vpop.f32.mrb[108].mxu1 }
 0x5aa   :  { %v2268_v52 = vpop.f32.mrb[109].mxu1  ;;  %p2790_p9 = por %p2789_p8, %p2788_p7 }
 0x5ab   :  { %v2269_v50 = vadd.f32 %v2268_v52, %v2267_v49  ;;  %v2270_v51 = vpop.f32.mrb[110].mxu1  ;;  %v1627_v53 = vpack.c.bf16 %v1606_v48, %v1605_v47 }
 0x5ac   :  { %v2271_v54 = vpop.f32.mrb[111].mxu1  ;;  %p2791_p10 = pnand %p2790_p9, %p2784_p6 }
 0x5ad   :  { %v1547_v55 = vadd.f32 %v2269_v50, %v3052_v56  ;;  %v2272_v11 = vadd.f32 %v2271_v54, %v2270_v51  ;;  %2501 = vmatprep.mubr.bf16.mxu0 %v1627_v53 }
 0x5af   :  { %v1550_v57 = vadd.f32 %v2272_v11, %v3052_v56  ;;  %v1607_v58 = vmax.f32 %v1547_v55, 0.0 }
 0x5b1   :  { %v1608_v59 = vmax.f32 %v1550_v57, 0.0  ;;  %v2273_v60 = vpop.f32.mrb[112].mxu1 }
 0x5b2   :  { %v2274_v61 = vpop.f32.mrb[113].mxu1 }
 0x5b3   :  { %v2275_v62 = vadd.f32 %v2274_v61, %v2273_v60  ;;  %v1628_v63 = vpack.c.bf16 %v1608_v59, %v1607_v58  ;;  %v2276_v0 = vpop.f32.mrb[114].mxu1 }
 0x5b4   :  { %v2277_v1 = vpop.f32.mrb[115].mxu1 }
 0x5b5   :  { %v1555_v2 = vadd.f32 %v2275_v62, %v3052_v56  ;;  %2502 = vmatmul.mubr.bf16.gmra.mrb[116].mxu0 %v1628_v63  ;;  %v2278_v3 = vadd.f32 %v2277_v1, %v2276_v0 }
 0x5b7   :  { %v1558_v4 = vadd.f32 %v2278_v3, %v3052_v56  ;;  %v1609_v5 = vmax.f32 %v1555_v2, 0.0 }
 0x5b9   :  { %v1610_v6 = vmax.f32 %v1558_v4, 0.0  ;;  %v2279_v7 = vpop.f32.mrb[116].mxu1 }
 0x5ba   :  { %v2280_v8 = vpop.f32.mrb[117].mxu1 }
 0x5bb   :  { %v2281_v9 = vadd.f32 %v2280_v8, %v2279_v7  ;;  %v2282_v10 = vpop.f32.mrb[118].mxu1  ;;  %v1629_v12 = vpack.c.bf16 %v1610_v6, %v1609_v5 }
 0x5bc   :  { %v2283_v13 = vpop.f32.mrb[119].mxu1 }
 0x5bd   :  { %v1563_v14 = vadd.f32 %v2281_v9, %v3052_v56  ;;  %v2284_v15 = vadd.f32 %v2283_v13, %v2282_v10  ;;  %2505 = vmatprep.mubr.bf16.mxu0 %v1629_v12 }
 0x5bf   :  { %v1566_v16 = vadd.f32 %v2284_v15, %v3052_v56  ;;  %v1611_v17 = vmax.f32 %v1563_v14, 0.0 }
 0x5c1   :  { %v1612_v18 = vmax.f32 %v1566_v16, 0.0  ;;  %v2285_v19 = vpop.f32.mrb[120].mxu1 }
 0x5c2   :  { %v2286_v20 = vpop.f32.mrb[121].mxu1 }
 0x5c3   :  { %v2287_v21 = vadd.f32 %v2286_v20, %v2285_v19  ;;  %v1630_v22 = vpack.c.bf16 %v1612_v18, %v1611_v17  ;;  %v2288_v23 = vpop.f32.mrb[122].mxu1 }
 0x5c4   :  { %v2289_v24 = vpop.f32.mrb[123].mxu1 }
 0x5c5   :  { %v1571_v25 = vadd.f32 %v2287_v21, %v3052_v56  ;;  %2506 = vmatmul.mubr.bf16.gmra.mrb[120].mxu0 %v1630_v22  ;;  %v2290_v26 = vadd.f32 %v2289_v24, %v2288_v23 }
 0x5c7   :  { %v1574_v27 = vadd.f32 %v2290_v26, %v3052_v56  ;;  %v1613_v28 = vmax.f32 %v1571_v25, 0.0 }
 0x5c9   :  { %v1614_v29 = vmax.f32 %v1574_v27, 0.0  ;;  %v2291_v30 = vpop.f32.mrb[124].mxu1 }
 0x5ca   :  { %v2292_v31 = vpop.f32.mrb[125].mxu1 }
 0x5cb   :  { %v2293_v32 = vadd.f32 %v2292_v31, %v2291_v30  ;;  %v2294_v33 = vpop.f32.mrb[126].mxu1  ;;  %v1631_v34 = vpack.c.bf16 %v1614_v29, %v1613_v28 }
 0x5cc   :  { %v2295_v35 = vpop.f32.mrb[127].mxu1 }
 0x5cd   :  { %v1579_v36 = vadd.f32 %v2293_v32, %v3052_v56  ;;  %v2296_v37 = vadd.f32 %v2295_v35, %v2294_v33  ;;  %2509 = vmatprep.mubr.bf16.mxu0 %v1631_v34 }
 0x5cf   :  { %v1582_v38 = vadd.f32 %v2296_v37, %v3052_v56  ;;  %v1615_v39 = vmax.f32 %v1579_v36, 0.0 }
 0x5d1   :  { %v1616_v40 = vmax.f32 %v1582_v38, 0.0 }
 0x5d3   :  { %v1632_v41 = vpack.c.bf16 %v1616_v40, %v1615_v39 }
 0x5d5   :  { %2510 = vmatmul.mubr.bf16.gmra.mrb[124].mxu0 %v1632_v41 }
 0x638   :  { %v2483_v46 = vpop.f32.mrb[96].mxu0 }
 0x639   :  { %v1747_v43 = vadd.f32 %v2483_v46, %v3089_v42  ;;  %v1738_v44 = vpop.f32.mrb[97].mxu0 }
 0x63a   :  { %v1739_v45 = vadd.f32 %v3089_v42, %v1738_v44  ;;  %v2484_v47 = vpop.f32.mrb[98].mxu0 }
 0x63b   :  { %1867 = vst [vmem:[#allocation13 + $0x10] sm:$0xff] %v1747_v43  ;;  %v1750_v48 = vadd.f32 %v2484_v47, %v3089_v42  ;;  %v1741_v56 = vpop.f32.mrb[99].mxu0 }
 0x63c   :  { %1865 = vst [vmem:[#allocation13] sm:$0xff] %v1739_v45  ;;  %v1742_v49 = vadd.f32 %v3089_v42, %v1741_v56 }
 0x63d   :  { %1868 = vst [vmem:[#allocation13 + $0x18] sm:$0xff] %v1750_v48 }
 0x63e   :  { %1866 = vst [vmem:[#allocation13 + $0x8] sm:$0xff] %v1742_v49 }
 0x648   :  { %v2487_v52 = vpop.f32.mrb[100].mxu0 }
 0x649   :  { %v1763_v50 = vadd.f32 %v2487_v52, %v3089_v42  ;;  %v1754_v51 = vpop.f32.mrb[101].mxu0 }
 0x64a   :  { %v1755_v53 = vadd.f32 %v3089_v42, %v1754_v51  ;;  %v2488_v54 = vpop.f32.mrb[102].mxu0 }
 0x64b   :  { %1871 = vst [vmem:[#allocation13 + $0x30] sm:$0xff] %v1763_v50  ;;  %v1766_v55 = vadd.f32 %v2488_v54, %v3089_v42  ;;  %v1757_v11 = vpop.f32.mrb[103].mxu0 }
 0x64c   :  { %1869 = vst [vmem:[#allocation13 + $0x20] sm:$0xff] %v1755_v53  ;;  %v1758_v57 = vadd.f32 %v3089_v42, %v1757_v11 }
 0x64d   :  { %1872 = vst [vmem:[#allocation13 + $0x38] sm:$0xff] %v1766_v55 }
 0x64e   :  { %1870 = vst [vmem:[#allocation13 + $0x28] sm:$0xff] %v1758_v57 }
 0x658   :  { %v2491_v58 = vpop.f32.mrb[104].mxu0 }
 0x659   :  { %v1779_v59 = vadd.f32 %v2491_v58, %v3089_v42  ;;  %v1770_v60 = vpop.f32.mrb[105].mxu0 }
 0x65a   :  { %v1771_v61 = vadd.f32 %v3089_v42, %v1770_v60  ;;  %v2492_v62 = vpop.f32.mrb[106].mxu0 }
 0x65b   :  { %1875 = vst [vmem:[#allocation13 + $0x50] sm:$0xff] %v1779_v59  ;;  %v1782_v63 = vadd.f32 %v2492_v62, %v3089_v42  ;;  %v1773_v0 = vpop.f32.mrb[107].mxu0 }
 0x65c   :  { %1873 = vst [vmem:[#allocation13 + $0x40] sm:$0xff] %v1771_v61  ;;  %v1774_v1 = vadd.f32 %v3089_v42, %v1773_v0 }
 0x65d   :  { %1876 = vst [vmem:[#allocation13 + $0x58] sm:$0xff] %v1782_v63 }
 0x65e   :  { %1874 = vst [vmem:[#allocation13 + $0x48] sm:$0xff] %v1774_v1 }
 0x668   :  { %v2495_v2 = vpop.f32.mrb[108].mxu0 }
 0x669   :  { %v1795_v3 = vadd.f32 %v2495_v2, %v3089_v42  ;;  %v1786_v4 = vpop.f32.mrb[109].mxu0 }
 0x66a   :  { %v1787_v5 = vadd.f32 %v3089_v42, %v1786_v4  ;;  %v2496_v6 = vpop.f32.mrb[110].mxu0 }
 0x66b   :  { %1879 = vst [vmem:[#allocation13 + $0x70] sm:$0xff] %v1795_v3  ;;  %v1798_v7 = vadd.f32 %v2496_v6, %v3089_v42  ;;  %v1789_v8 = vpop.f32.mrb[111].mxu0 }
 0x66c   :  { %1877 = vst [vmem:[#allocation13 + $0x60] sm:$0xff] %v1787_v5  ;;  %v1790_v9 = vadd.f32 %v3089_v42, %v1789_v8 }
 0x66d   :  { %1880 = vst [vmem:[#allocation13 + $0x78] sm:$0xff] %v1798_v7 }
 0x66e   :  { %1878 = vst [vmem:[#allocation13 + $0x68] sm:$0xff] %v1790_v9 }
 0x678   :  { %v2499_v10 = vpop.f32.mrb[112].mxu0 }
 0x679   :  { %v1811_v12 = vadd.f32 %v2499_v10, %v3089_v42  ;;  %v1802_v13 = vpop.f32.mrb[113].mxu0 }
 0x67a   :  { %v1803_v14 = vadd.f32 %v3089_v42, %v1802_v13  ;;  %v2500_v15 = vpop.f32.mrb[114].mxu0 }
 0x67b   :  { %1883 = vst [vmem:[#allocation13 + $0x90] sm:$0xff] %v1811_v12  ;;  %v1814_v16 = vadd.f32 %v2500_v15, %v3089_v42  ;;  %v1805_v17 = vpop.f32.mrb[115].mxu0 }
 0x67c   :  { %1881 = vst [vmem:[#allocation13 + $0x80] sm:$0xff] %v1803_v14  ;;  %v1806_v18 = vadd.f32 %v3089_v42, %v1805_v17 }
 0x67d   :  { %1884 = vst [vmem:[#allocation13 + $0x98] sm:$0xff] %v1814_v16 }
 0x67e   :  { %1882 = vst [vmem:[#allocation13 + $0x88] sm:$0xff] %v1806_v18 }
 0x688   :  { %v2503_v19 = vpop.f32.mrb[116].mxu0 }
 0x689   :  { %v1827_v20 = vadd.f32 %v2503_v19, %v3089_v42  ;;  %v1818_v21 = vpop.f32.mrb[117].mxu0 }
 0x68a   :  { %v1819_v22 = vadd.f32 %v3089_v42, %v1818_v21  ;;  %v2504_v23 = vpop.f32.mrb[118].mxu0 }
 0x68b   :  { %1887 = vst [vmem:[#allocation13 + $0xb0] sm:$0xff] %v1827_v20  ;;  %v1830_v24 = vadd.f32 %v2504_v23, %v3089_v42  ;;  %v1821_v25 = vpop.f32.mrb[119].mxu0 }
 0x68c   :  { %1885 = vst [vmem:[#allocation13 + $0xa0] sm:$0xff] %v1819_v22  ;;  %v1822_v26 = vadd.f32 %v3089_v42, %v1821_v25 }
 0x68d   :  { %1888 = vst [vmem:[#allocation13 + $0xb8] sm:$0xff] %v1830_v24 }
 0x68e   :  { %1886 = vst [vmem:[#allocation13 + $0xa8] sm:$0xff] %v1822_v26 }
 0x698   :  { %v2507_v27 = vpop.f32.mrb[120].mxu0 }
 0x699   :  { %v1843_v28 = vadd.f32 %v2507_v27, %v3089_v42  ;;  %v1834_v29 = vpop.f32.mrb[121].mxu0 }
 0x69a   :  { %v1835_v30 = vadd.f32 %v3089_v42, %v1834_v29  ;;  %v2508_v31 = vpop.f32.mrb[122].mxu0 }
 0x69b   :  { %1891 = vst [vmem:[#allocation13 + $0xd0] sm:$0xff] %v1843_v28  ;;  %v1846_v32 = vadd.f32 %v2508_v31, %v3089_v42  ;;  %v1837_v33 = vpop.f32.mrb[123].mxu0 }
 0x69c   :  { %1889 = vst [vmem:[#allocation13 + $0xc0] sm:$0xff] %v1835_v30  ;;  %v1838_v34 = vadd.f32 %v3089_v42, %v1837_v33 }
 0x69d   :  { %1892 = vst [vmem:[#allocation13 + $0xd8] sm:$0xff] %v1846_v32 }
 0x69e   :  { %1890 = vst [vmem:[#allocation13 + $0xc8] sm:$0xff] %v1838_v34 }
 0x6a8   :  { %v2511_v35 = vpop.f32.mrb[124].mxu0 }
 0x6a9   :  { %v1859_v36 = vadd.f32 %v2511_v35, %v3089_v42  ;;  %v1850_v37 = vpop.f32.mrb[125].mxu0 }
 0x6aa   :  { %v1851_v38 = vadd.f32 %v3089_v42, %v1850_v37  ;;  %v2512_v39 = vpop.f32.mrb[126].mxu0 }
 0x6ab   :  { %1895 = vst [vmem:[#allocation13 + $0xf0] sm:$0xff] %v1859_v36  ;;  %v1862_v40 = vadd.f32 %v2512_v39, %v3089_v42  ;;  %v1853_v41 = vpop.f32.mrb[127].mxu0 }
 0x6ac   :  { %1893 = vst [vmem:[#allocation13 + $0xe0] sm:$0xff] %v1851_v38  ;;  %v1854_v46 = vadd.f32 %v3089_v42, %v1853_v41 }
 0x6ad   :  { %1896 = vst [vmem:[#allocation13 + $0xf8] sm:$0xff] %v1862_v40 }
 0x6ae   :  { %1894 = vst [vmem:[#allocation13 + $0xe8] sm:$0xff] %v1854_v46 }
 0x6af   :  { %2794 = shalt.err (!%p2791_p10)
}
 0x6b0   :  { %s2795_s1 = scalar_lea.hbm %s3148_s10, 4096 }
 0x6b1   :  { %p2796_p11 = scmp.ne.s32.totalorder %s3148_s10, %s2795_s1  ;;  %p2799_p12 = scmp.lt.u32.totalorder %s2795_s1, %s3148_s10 }
 0x6b3   :  { %p2801_p13 = pnand %p2799_p12, %p2796_p11 }
 0x6b5   :  { %2804 = shalt.err (!%p2801_p13)
}
 0x6b6   :  { %1908 = dma.vmem_to_hbm [thread:$0]  %s1903_s12, 4096, %s3148_s10, [#allocation4], %s2820_s4, %s2820_s4, %s2821_s28  }
 0x6b7   :  { %2813 = dma.done.wait [#allocation4], 4096  }
 0x6b8   :  { %2814 = vsyncadd [#allocation4], 4294963200 }
 0x6b9   :  { %1912 = vsyncpa [#allocation3], 1 }
 0x6ba   :  { %1913 = vsyncpa [#allocation6], 1 }
 0x6bb   :  { %1914 = vsyncpa [#allocation9], 1 }
 0x6bc   :  { %1915 = vsyncpa [#allocation12], 1 }
 0x6bd   :  { %1916 = vsyncpa [#allocation4], 1 }

</bundles_post_ra>
